<compile_context>
chip_gen: v7x
topology: tpu7x:2x2x1
jax: 0.10.0
libtpu: 0.0.40
codegen_flags: <defaults>
</compile_context>

<pallas_src>
import functools

import jax
import jax.numpy as jnp
from jax.experimental import pallas as pl
from jax.experimental.pallas import tpu as pltpu

EPS = 1e-5  # torch.nn.LayerNorm default


def _layernorm(x, gamma, beta):
    mu = jnp.mean(x, axis=-1, keepdims=True)
    var = jnp.mean((x - mu) ** 2, axis=-1, keepdims=True)
    return (x - mu) * jax.lax.rsqrt(var + EPS) * gamma + beta


def _attention_ffwd_body(x_tile, h_tile, kv_b, vec_ref, fb1_ref,
                         wqt_ref, wpt_ref, w1t_ref, w2t_ref, o_ref, num_heads):
    """Shared body: multi-head static attention + projection + FFW + residuals.

    x_tile : (tB, E) f32   residual-stream rows owned by this grid step
    h_tile : (tB, E) f32   LayerNorm1(x_tile)
    kv_b   : (B, 2E) bf16  [K | V] = LN1(x_full) @ [wk|wv]^T, head-major columns
    """
    f32 = jnp.float32
    bf16 = jnp.bfloat16
    tB, E = o_ref.shape
    hs = E // num_heads

    g2, be2 = vec_ref[2:3, :], vec_ref[3:4, :]
    bp, fb2 = vec_ref[4:5, :], vec_ref[5:6, :]

    # Queries for this row tile. 1/sqrt(head_size) is pre-folded into wqt (host side),
    # so scores come out of the MXU already scaled.
    q_all = jnp.dot(h_tile.astype(bf16), wqt_ref[...],
                    preferred_element_type=f32)                       # (tB, E) f32
    q_b = q_all.astype(bf16)                                          # cast once, slice per head

    # Per-head static attention (attention is over the batch axis -> (tB, B) scores).
    head_outs = []
    for hi in range(num_heads):                                       # static unroll, H small
        c0 = hi * hs
        q = q_b[:, c0:c0 + hs]                                        # (tB, hs) bf16
        k = kv_b[:, c0:c0 + hs]                                       # (B, hs)  bf16
        v = kv_b[:, E + c0:E + c0 + hs]                               # (B, hs)  bf16
        s = jax.lax.dot_general(q, k, (((1,), (1,)), ((), ())),
                                preferred_element_type=f32)           # (tB, B), pre-scaled
        s = s - jnp.max(s, axis=-1, keepdims=True)
        p = jnp.exp(s)
        p = p * pl.reciprocal(jnp.sum(p, axis=-1, keepdims=True), approx=True)
        # dropout(p): identity in eval mode
        head_outs.append(jnp.dot(p.astype(bf16), v, preferred_element_type=f32))

    # One lane-dense, E-deep output projection instead of num_heads K=hs matmuls.
    att = jnp.concatenate(head_outs, axis=-1).astype(bf16)            # (tB, E) bf16
    sa = jnp.dot(att, wpt_ref[...], preferred_element_type=f32) + bp  # (tB, E) f32
    # dropout(proj(...)): identity in eval mode

    x1 = x_tile + sa

    # FeedForward branch: x + W2(relu(W1(ln2(x))))
    h2 = _layernorm(x1, g2, be2)
    f = jnp.dot(h2.astype(bf16), w1t_ref[...],
                preferred_element_type=f32) + fb1_ref[...]            # (tB, 4E)
    f = jnp.maximum(f, 0.0)
    f2 = jnp.dot(f.astype(bf16), w2t_ref[...],
                 preferred_element_type=f32) + fb2                    # (tB, E)
    # dropout: identity in eval mode

    o_ref[...] = (x1 + f2).astype(o_ref.dtype)


def block_kernel_fused(x_ref, vec_ref, fb1_ref, wqt_ref, wkvt_ref, wpt_ref,
                       w1t_ref, w2t_ref, o_ref, *, num_heads):
    """Single-tile kernel (tile == full batch): LN1 + K/V are computed once, in-kernel."""
    f32 = jnp.float32
    bf16 = jnp.bfloat16
    x = x_ref[...].astype(f32)
    g1, be1 = vec_ref[0:1, :], vec_ref[1:2, :]
    h = _layernorm(x, g1, be1)
    kv_b = jnp.dot(h.astype(bf16), wkvt_ref[...],
                   preferred_element_type=f32).astype(bf16)           # (B, 2E)
    _attention_ffwd_body(x, h, kv_b, vec_ref, fb1_ref, wqt_ref, wpt_ref,
                         w1t_ref, w2t_ref, o_ref, num_heads)


def block_kernel_tiled(x_ref, kv_ref, vec_ref, fb1_ref, wqt_ref, wpt_ref,
                       w1t_ref, w2t_ref, o_ref, *, num_heads):
    """Row-tiled kernel for large B: the full-batch LN1 + K/V projection is hoisted to a
    single XLA matmul outside the grid loop and passed in as a resident (B,2E) bf16
    operand, so it is never recomputed per tile. Only the per-tile LN1 runs here."""
    f32 = jnp.float32
    x = x_ref[...].astype(f32)
    g1, be1 = vec_ref[0:1, :], vec_ref[1:2, :]
    h = _layernorm(x, g1, be1)
    _attention_ffwd_body(x, h, kv_ref[...], vec_ref, fb1_ref, wqt_ref, wpt_ref,
                         w1t_ref, w2t_ref, o_ref, num_heads)


def _pick_row_tile(B):
    """Whole batch in one tile unless B is large enough that splitting gives each
    TensorCore an MXU-meaningful (>=128-row) slab (review opts #5/#6)."""
    if B < 256 or B % 128 != 0:
        return B
    for t in (256, 128):
        if B % t == 0 and B // t >= 2:
            return t
    return B


def _vmem_limit_bytes(resident_in_bytes, tile_in_bytes, tile_out_bytes):
    """Budget from actual block shapes (Pallas double-buffers every operand by default),
    plus headroom for in-kernel f32 temporaries; cap is generation-aware."""
    pipelined = 2 * (resident_in_bytes + tile_in_bytes + tile_out_bytes)
    budget = pipelined + max(pipelined, 8 << 20)
    try:
        phys = pltpu.get_tpu_info().vmem_capacity_bytes   # 128 MiB v5e/v6e, 64 MiB v7x core
    except Exception:
        phys = 64 << 20                                    # assume the smallest (v7x)
    cap = (phys // 8) * 7                                  # leave compiler headroom
    return int(min(max(budget, 8 << 20), cap))


def block_forward(x, params, n_head):
    (wk, wq, wv, wp, bp, g1, be1, g2, be2, w1, fb1, w2, fb2) = params
    B, E = x.shape
    hs = E // n_head
    bf16 = jnp.bfloat16
    f32 = jnp.float32

    # Host-side (trace-time, free) weight packing:
    #  * per-head Q and K/V projections fused into lane-dense matmul weights
    #  * everything pre-transposed to (in, out): the kernel never transposes
    #  * bf16 matmul weights (halves weight DMA, feeds the bf16 MXU path)
    #  * 1/sqrt(head_size) folded into the query weights
    scale = hs ** -0.5
    wq_t = (wq.reshape(E, E).T * scale).astype(bf16)                  # (E, E)
    wkv_t = jnp.concatenate([wk.reshape(E, E), wv.reshape(E, E)],
                            axis=0).T.astype(bf16)                    # (E, 2E) = [K | V]
    wp_t = wp.T.astype(bf16)                                          # (E, E)
    w1_t = w1.T.astype(bf16)                                          # (E, 4E)
    w2_t = w2.T.astype(bf16)                                          # (4E, E)
    # Seven small f32 vectors packed into two operands (fewer DMAs / descriptors):
    vecs = jnp.concatenate([g1, be1, g2, be2, bp, fb2], axis=0).astype(f32)  # (6, E)
    fb1 = fb1.astype(f32)                                             # (1, 4E)

    tB = _pick_row_tile(B)
    grid = (B // tB,)

    x_spec = pl.BlockSpec((tB, E), lambda i: (i, 0))
    out_spec = pl.BlockSpec((tB, E), lambda i: (i, 0))

    if grid[0] == 1:
        # Whole batch in one grid step: LN1 + K/V computed exactly once, in-kernel.
        ins = (x, vecs, fb1, wq_t, wkv_t, wp_t, w1_t, w2_t)
        kernel = functools.partial(block_kernel_fused, num_heads=n_head)
    else:
        # Large batch: hoist the full-batch LN1 + K/V projection out of the grid loop
        # (review opt #1) — one XLA matmul, result passed in as a resident bf16 operand.
        h_full = _layernorm(x.astype(f32), g1, be1)
        kv = jnp.dot(h_full.astype(bf16), wkv_t,
                     preferred_element_type=f32).astype(bf16)         # (B, 2E)
        ins = (x, kv, vecs, fb1, wq_t, wp_t, w1_t, w2_t)
        kernel = functools.partial(block_kernel_tiled, num_heads=n_head)

    resident = ins[1:]
    in_specs = [x_spec] + [pl.BlockSpec(tuple(a.shape), lambda i: (0, 0))
                           for a in resident]

    tile_bytes = tB * E * x.dtype.itemsize
    resident_bytes = sum(int(a.size) * a.dtype.itemsize for a in resident)
    vmem_limit = _vmem_limit_bytes(resident_bytes, tile_bytes, tile_bytes)

    return pl.pallas_call(
        kernel,
        out_shape=jax.ShapeDtypeStruct((B, E), x.dtype),
        grid=grid,
        in_specs=in_specs,
        out_specs=out_spec,
        compiler_params=pltpu.CompilerParams(
            dimension_semantics=("parallel",),
            vmem_limit_bytes=vmem_limit,
        ),
    )(*ins)


def block_reference(x, params, num_heads, mm_dtype=None):
    """Pure-JAX reference of Block.forward (eval mode).

    mm_dtype=None         -> full f32 (matches the PyTorch module exactly)
    mm_dtype=jnp.bfloat16 -> mirrors the kernel's MXU precision (bf16 operands, f32 acc)
    """
    (wk, wq, wv, wp, bp, g1, be1, g2, be2, w1, fb1, w2, fb2) = params
    hs = wk.shape[1]

    def mm(a, b):
        if mm_dtype is not None:
            a = a.astype(mm_dtype)
            b = b.astype(mm_dtype)
        return jnp.dot(a, b, preferred_element_type=jnp.float32)

    def ln(z, g, b):
        mu = jnp.mean(z, -1, keepdims=True)
        var = jnp.mean((z - mu) ** 2, -1, keepdims=True)
        return (z - mu) / jnp.sqrt(var + EPS) * g + b

    h = ln(x, g1, be1)
    outs = []
    for hi in range(num_heads):
        k = mm(h, wk[hi].T)
        q = mm(h, wq[hi].T)
        v = mm(h, wv[hi].T)
        wei = jax.nn.softmax(mm(q, k.T) * (hs ** -0.5), axis=-1)
        outs.append(mm(wei, v))
    sa = mm(jnp.concatenate(outs, -1), wp.T) + bp
    x = x + sa
    h2 = ln(x, g2, be2)
    f = jnp.maximum(mm(h2, w1.T) + fb1, 0.0)
    return x + mm(f, w2.T) + fb2


def init_params(key, n_embd, n_head):
    head_size = n_embd // n_head
    ks = jax.random.split(key, 13)

    def lin(k, out_dim, in_dim):
        # ~1/sqrt(fan_in) init keeps activations O(1) (like nn.Linear defaults)
        return jax.random.normal(k, (out_dim, in_dim), jnp.float32) * (0.5 / in_dim ** 0.5)

    wk = lin(ks[0], n_embd, n_embd).reshape(n_head, head_size, n_embd)
    wq = lin(ks[1], n_embd, n_embd).reshape(n_head, head_size, n_embd)
    wv = lin(ks[2], n_embd, n_embd).reshape(n_head, head_size, n_embd)
    wp = lin(ks[3], n_embd, n_embd)
    bp = jax.random.normal(ks[4], (1, n_embd), jnp.float32) * 0.05
    g1 = 1.0 + jax.random.normal(ks[5], (1, n_embd), jnp.float32) * 0.05
    be1 = jax.random.normal(ks[6], (1, n_embd), jnp.float32) * 0.05
    g2 = 1.0 + jax.random.normal(ks[7], (1, n_embd), jnp.float32) * 0.05
    be2 = jax.random.normal(ks[8], (1, n_embd), jnp.float32) * 0.05
    w1 = lin(ks[9], 4 * n_embd, n_embd)
    fb1 = jax.random.normal(ks[10], (1, 4 * n_embd), jnp.float32) * 0.05
    w2 = lin(ks[11], n_embd, 4 * n_embd)
    fb2 = jax.random.normal(ks[12], (1, n_embd), jnp.float32) * 0.05
    return (wk, wq, wv, wp, bp, g1, be1, g2, be2, w1, fb1, w2, fb2)


if __name__ == "__main__":
    # Small but lane-aligned shapes: n_embd multiple of 128; B=16 -> single-tile fused path.
    B, n_embd, n_head = 16, 128, 4
    key = jax.random.PRNGKey(0)
    kx, kp = jax.random.split(key)
    x = jax.random.normal(kx, (B, n_embd), jnp.float32)
    params = init_params(kp, n_embd, n_head)

    out = jax.block_until_ready(block_forward(x, params, n_head))
    assert out.shape == (B, n_embd)

    # Tight check against a reference that mirrors the kernel's mixed precision
    # (bf16 MXU operands, f32 accumulation) — validates the kernel math/indexing.
    ref_bf16 = jax.block_until_ready(block_reference(x, params, n_head, mm_dtype=jnp.bfloat16))
    assert jnp.allclose(out, ref_bf16, atol=2e-2, rtol=2e-2), (
        "mismatch vs bf16-mirror reference: max abs err = "
        f"{float(jnp.max(jnp.abs(out - ref_bf16)))}")

    # Looser check against the exact f32 semantics of the PyTorch module
    # (tolerance relaxed because the kernel runs its matmuls in bf16).
    ref_f32 = jax.block_until_ready(block_reference(x, params, n_head, mm_dtype=None))
    assert jnp.allclose(out, ref_f32, atol=5e-2, rtol=5e-2), (
        "mismatch vs f32 reference: max abs err = "
        f"{float(jnp.max(jnp.abs(out - ref_f32)))}")

    print("KERNEL_OK")
</pallas_src>

<mosaic_0001>
module attributes {stable_mosaic.version = 11 : i64} {
  func.func @block_kernel_fused(%arg0: i32, %arg1: memref<16x128xf32, #tpu.memory_space<vmem>>, %arg2: memref<6x128xf32, #tpu.memory_space<vmem>>, %arg3: memref<1x512xf32, #tpu.memory_space<vmem>>, %arg4: memref<128x128xbf16, #tpu.memory_space<vmem>>, %arg5: memref<128x256xbf16, #tpu.memory_space<vmem>>, %arg6: memref<128x128xbf16, #tpu.memory_space<vmem>>, %arg7: memref<128x512xbf16, #tpu.memory_space<vmem>>, %arg8: memref<512x128xbf16, #tpu.memory_space<vmem>>, %arg9: memref<16x128xf32, #tpu.memory_space<vmem>>) attributes {dimension_semantics = [#tpu.dimension_semantics<parallel>], iteration_bounds = array<i64: 1>, scalar_prefetch = 0 : i64, scratch_operands = 0 : i64, tpu.core_type = #tpu.core_type<tc>, window_params = [{transform_indices = @transform_0, window_bounds = array<i64: 16, 128>}, {pipeline_mode = #tpu.pipeline_mode<synchronous>, transform_indices = @transform_1, window_bounds = array<i64: 6, 128>}, {pipeline_mode = #tpu.pipeline_mode<synchronous>, transform_indices = @transform_2, window_bounds = array<i64: 1, 512>}, {pipeline_mode = #tpu.pipeline_mode<synchronous>, transform_indices = @transform_3, window_bounds = array<i64: 128, 128>}, {pipeline_mode = #tpu.pipeline_mode<synchronous>, transform_indices = @transform_4, window_bounds = array<i64: 128, 256>}, {pipeline_mode = #tpu.pipeline_mode<synchronous>, transform_indices = @transform_5, window_bounds = array<i64: 128, 128>}, {pipeline_mode = #tpu.pipeline_mode<synchronous>, transform_indices = @transform_6, window_bounds = array<i64: 128, 512>}, {pipeline_mode = #tpu.pipeline_mode<synchronous>, transform_indices = @transform_7, window_bounds = array<i64: 512, 128>}, {transform_indices = @transform_8, window_bounds = array<i64: 16, 128>}]} {
    %c0 = arith.constant 0 : index
    %c0_0 = arith.constant 0 : index
    %0 = vector.load %arg1[%c0, %c0_0] : memref<16x128xf32, #tpu.memory_space<vmem>>, vector<16x128xf32>
    %c0_1 = arith.constant 0 : index
    %c0_2 = arith.constant 0 : index
    %1 = vector.load %arg2[%c0_1, %c0_2] : memref<6x128xf32, #tpu.memory_space<vmem>>, vector<1x128xf32>
    %c1 = arith.constant 1 : index
    %c0_3 = arith.constant 0 : index
    %2 = vector.load %arg2[%c1, %c0_3] : memref<6x128xf32, #tpu.memory_space<vmem>>, vector<1x128xf32>
    %cst = arith.constant dense<0.000000e+00> : vector<16xf32>
    %3 = vector.multi_reduction <add>, %0, %cst [1] : vector<16x128xf32> to vector<16xf32>
    %4 = vector.shape_cast %3 : vector<16xf32> to vector<16x1xf32>
    %cst_4 = arith.constant 1.280000e+02 : f32
    %5 = vector.broadcast %cst_4 : f32 to vector<16x1xf32>
    %6 = arith.divf %4, %5 : vector<16x1xf32>
    %7 = vector.broadcast %6 : vector<16x1xf32> to vector<16x128xf32>
    %8 = arith.subf %0, %7 : vector<16x128xf32>
    %9 = arith.mulf %8, %8 : vector<16x128xf32>
    %cst_5 = arith.constant dense<0.000000e+00> : vector<16xf32>
    %10 = vector.multi_reduction <add>, %9, %cst_5 [1] : vector<16x128xf32> to vector<16xf32>
    %11 = vector.shape_cast %10 : vector<16xf32> to vector<16x1xf32>
    %cst_6 = arith.constant 1.280000e+02 : f32
    %12 = vector.broadcast %cst_6 : f32 to vector<16x1xf32>
    %13 = arith.divf %11, %12 : vector<16x1xf32>
    %14 = vector.broadcast %6 : vector<16x1xf32> to vector<16x128xf32>
    %15 = arith.subf %0, %14 : vector<16x128xf32>
    %cst_7 = arith.constant 9.99999974E-6 : f32
    %16 = vector.broadcast %cst_7 : f32 to vector<16x1xf32>
    %17 = arith.addf %13, %16 : vector<16x1xf32>
    %18 = math.rsqrt %17 : vector<16x1xf32>
    %19 = vector.broadcast %18 : vector<16x1xf32> to vector<16x128xf32>
    %20 = arith.mulf %15, %19 : vector<16x128xf32>
    %21 = vector.broadcast %1 : vector<1x128xf32> to vector<16x128xf32>
    %22 = arith.mulf %20, %21 : vector<16x128xf32>
    %23 = vector.broadcast %2 : vector<1x128xf32> to vector<16x128xf32>
    %24 = arith.addf %22, %23 : vector<16x128xf32>
    %25 = arith.truncf %24 : vector<16x128xf32> to vector<16x128xbf16>
    %c0_8 = arith.constant 0 : index
    %c0_9 = arith.constant 0 : index
    %26 = vector.load %arg5[%c0_8, %c0_9] : memref<128x256xbf16, #tpu.memory_space<vmem>>, vector<128x256xbf16>
    %cst_10 = arith.constant dense<0.000000e+00> : vector<16x256xf32>
    %27 = tpu.matmul %25, %26, %cst_10 {dimension_numbers = #tpu.dot_dimension_numbers<[1], [0], [0], [1], [0, 0, 1, 1], [], []>} : vector<16x128xbf16>, vector<128x256xbf16>, vector<16x256xf32> -> vector<16x256xf32>
    %28 = arith.truncf %27 : vector<16x256xf32> to vector<16x256xbf16>
    %c2 = arith.constant 2 : index
    %c0_11 = arith.constant 0 : index
    %29 = vector.load %arg2[%c2, %c0_11] : memref<6x128xf32, #tpu.memory_space<vmem>>, vector<1x128xf32>
    %c3 = arith.constant 3 : index
    %c0_12 = arith.constant 0 : index
    %30 = vector.load %arg2[%c3, %c0_12] : memref<6x128xf32, #tpu.memory_space<vmem>>, vector<1x128xf32>
    %c4 = arith.constant 4 : index
    %c0_13 = arith.constant 0 : index
    %31 = vector.load %arg2[%c4, %c0_13] : memref<6x128xf32, #tpu.memory_space<vmem>>, vector<1x128xf32>
    %c5 = arith.constant 5 : index
    %c0_14 = arith.constant 0 : index
    %32 = vector.load %arg2[%c5, %c0_14] : memref<6x128xf32, #tpu.memory_space<vmem>>, vector<1x128xf32>
    %33 = arith.truncf %24 : vector<16x128xf32> to vector<16x128xbf16>
    %c0_15 = arith.constant 0 : index
    %c0_16 = arith.constant 0 : index
    %34 = vector.load %arg4[%c0_15, %c0_16] : memref<128x128xbf16, #tpu.memory_space<vmem>>, vector<128x128xbf16>
    %cst_17 = arith.constant dense<0.000000e+00> : vector<16x128xf32>
    %35 = tpu.matmul %33, %34, %cst_17 {dimension_numbers = #tpu.dot_dimension_numbers<[1], [0], [0], [1], [0, 0, 1, 1], [], []>} : vector<16x128xbf16>, vector<128x128xbf16>, vector<16x128xf32> -> vector<16x128xf32>
    %36 = arith.truncf %35 : vector<16x128xf32> to vector<16x128xbf16>
    %37 = vector.extract_strided_slice %36 {offsets = [0, 0], sizes = [16, 32], strides = [1, 1]} : vector<16x128xbf16> to vector<16x32xbf16>
    %38 = vector.extract_strided_slice %28 {offsets = [0, 0], sizes = [16, 32], strides = [1, 1]} : vector<16x256xbf16> to vector<16x32xbf16>
    %39 = vector.extract_strided_slice %28 {offsets = [0, 128], sizes = [16, 32], strides = [1, 1]} : vector<16x256xbf16> to vector<16x32xbf16>
    %cst_18 = arith.constant dense<0.000000e+00> : vector<16x16xf32>
    %40 = tpu.matmul %37, %38, %cst_18 {dimension_numbers = #tpu.dot_dimension_numbers<[1], [1], [0], [0], [0, 0, 1, 0], [], []>} : vector<16x32xbf16>, vector<16x32xbf16>, vector<16x16xf32> -> vector<16x16xf32>
    %cst_19 = arith.constant dense<0xFF800000> : vector<16xf32>
    %41 = vector.multi_reduction <maximumf>, %40, %cst_19 [1] : vector<16x16xf32> to vector<16xf32>
    %42 = vector.shape_cast %41 : vector<16xf32> to vector<16x1xf32>
    %43 = vector.broadcast %42 : vector<16x1xf32> to vector<16x16xf32>
    %44 = arith.subf %40, %43 : vector<16x16xf32>
    %45 = math.exp %44 : vector<16x16xf32>
    %cst_20 = arith.constant dense<0.000000e+00> : vector<16xf32>
    %46 = vector.multi_reduction <add>, %45, %cst_20 [1] : vector<16x16xf32> to vector<16xf32>
    %47 = vector.shape_cast %46 : vector<16xf32> to vector<16x1xf32>
    %48 = tpu.reciprocal %47 {approx = true} : vector<16x1xf32> -> vector<16x1xf32>
    %49 = vector.broadcast %48 : vector<16x1xf32> to vector<16x16xf32>
    %50 = arith.mulf %45, %49 : vector<16x16xf32>
    %51 = arith.truncf %50 : vector<16x16xf32> to vector<16x16xbf16>
    %cst_21 = arith.constant dense<0.000000e+00> : vector<16x32xf32>
    %52 = tpu.matmul %51, %39, %cst_21 {dimension_numbers = #tpu.dot_dimension_numbers<[1], [0], [0], [1], [0, 0, 1, 1], [], []>} : vector<16x16xbf16>, vector<16x32xbf16>, vector<16x32xf32> -> vector<16x32xf32>
    %53 = vector.extract_strided_slice %36 {offsets = [0, 32], sizes = [16, 32], strides = [1, 1]} : vector<16x128xbf16> to vector<16x32xbf16>
    %54 = vector.extract_strided_slice %28 {offsets = [0, 32], sizes = [16, 32], strides = [1, 1]} : vector<16x256xbf16> to vector<16x32xbf16>
    %55 = vector.extract_strided_slice %28 {offsets = [0, 160], sizes = [16, 32], strides = [1, 1]} : vector<16x256xbf16> to vector<16x32xbf16>
    %cst_22 = arith.constant dense<0.000000e+00> : vector<16x16xf32>
    %56 = tpu.matmul %53, %54, %cst_22 {dimension_numbers = #tpu.dot_dimension_numbers<[1], [1], [0], [0], [0, 0, 1, 0], [], []>} : vector<16x32xbf16>, vector<16x32xbf16>, vector<16x16xf32> -> vector<16x16xf32>
    %cst_23 = arith.constant dense<0xFF800000> : vector<16xf32>
    %57 = vector.multi_reduction <maximumf>, %56, %cst_23 [1] : vector<16x16xf32> to vector<16xf32>
    %58 = vector.shape_cast %57 : vector<16xf32> to vector<16x1xf32>
    %59 = vector.broadcast %58 : vector<16x1xf32> to vector<16x16xf32>
    %60 = arith.subf %56, %59 : vector<16x16xf32>
    %61 = math.exp %60 : vector<16x16xf32>
    %cst_24 = arith.constant dense<0.000000e+00> : vector<16xf32>
    %62 = vector.multi_reduction <add>, %61, %cst_24 [1] : vector<16x16xf32> to vector<16xf32>
    %63 = vector.shape_cast %62 : vector<16xf32> to vector<16x1xf32>
    %64 = tpu.reciprocal %63 {approx = true} : vector<16x1xf32> -> vector<16x1xf32>
    %65 = vector.broadcast %64 : vector<16x1xf32> to vector<16x16xf32>
    %66 = arith.mulf %61, %65 : vector<16x16xf32>
    %67 = arith.truncf %66 : vector<16x16xf32> to vector<16x16xbf16>
    %cst_25 = arith.constant dense<0.000000e+00> : vector<16x32xf32>
    %68 = tpu.matmul %67, %55, %cst_25 {dimension_numbers = #tpu.dot_dimension_numbers<[1], [0], [0], [1], [0, 0, 1, 1], [], []>} : vector<16x16xbf16>, vector<16x32xbf16>, vector<16x32xf32> -> vector<16x32xf32>
    %69 = vector.extract_strided_slice %36 {offsets = [0, 64], sizes = [16, 32], strides = [1, 1]} : vector<16x128xbf16> to vector<16x32xbf16>
    %70 = vector.extract_strided_slice %28 {offsets = [0, 64], sizes = [16, 32], strides = [1, 1]} : vector<16x256xbf16> to vector<16x32xbf16>
    %71 = vector.extract_strided_slice %28 {offsets = [0, 192], sizes = [16, 32], strides = [1, 1]} : vector<16x256xbf16> to vector<16x32xbf16>
    %cst_26 = arith.constant dense<0.000000e+00> : vector<16x16xf32>
    %72 = tpu.matmul %69, %70, %cst_26 {dimension_numbers = #tpu.dot_dimension_numbers<[1], [1], [0], [0], [0, 0, 1, 0], [], []>} : vector<16x32xbf16>, vector<16x32xbf16>, vector<16x16xf32> -> vector<16x16xf32>
    %cst_27 = arith.constant dense<0xFF800000> : vector<16xf32>
    %73 = vector.multi_reduction <maximumf>, %72, %cst_27 [1] : vector<16x16xf32> to vector<16xf32>
    %74 = vector.shape_cast %73 : vector<16xf32> to vector<16x1xf32>
    %75 = vector.broadcast %74 : vector<16x1xf32> to vector<16x16xf32>
    %76 = arith.subf %72, %75 : vector<16x16xf32>
    %77 = math.exp %76 : vector<16x16xf32>
    %cst_28 = arith.constant dense<0.000000e+00> : vector<16xf32>
    %78 = vector.multi_reduction <add>, %77, %cst_28 [1] : vector<16x16xf32> to vector<16xf32>
    %79 = vector.shape_cast %78 : vector<16xf32> to vector<16x1xf32>
    %80 = tpu.reciprocal %79 {approx = true} : vector<16x1xf32> -> vector<16x1xf32>
    %81 = vector.broadcast %80 : vector<16x1xf32> to vector<16x16xf32>
    %82 = arith.mulf %77, %81 : vector<16x16xf32>
    %83 = arith.truncf %82 : vector<16x16xf32> to vector<16x16xbf16>
    %cst_29 = arith.constant dense<0.000000e+00> : vector<16x32xf32>
    %84 = tpu.matmul %83, %71, %cst_29 {dimension_numbers = #tpu.dot_dimension_numbers<[1], [0], [0], [1], [0, 0, 1, 1], [], []>} : vector<16x16xbf16>, vector<16x32xbf16>, vector<16x32xf32> -> vector<16x32xf32>
    %85 = vector.extract_strided_slice %36 {offsets = [0, 96], sizes = [16, 32], strides = [1, 1]} : vector<16x128xbf16> to vector<16x32xbf16>
    %86 = vector.extract_strided_slice %28 {offsets = [0, 96], sizes = [16, 32], strides = [1, 1]} : vector<16x256xbf16> to vector<16x32xbf16>
    %87 = vector.extract_strided_slice %28 {offsets = [0, 224], sizes = [16, 32], strides = [1, 1]} : vector<16x256xbf16> to vector<16x32xbf16>
    %cst_30 = arith.constant dense<0.000000e+00> : vector<16x16xf32>
    %88 = tpu.matmul %85, %86, %cst_30 {dimension_numbers = #tpu.dot_dimension_numbers<[1], [1], [0], [0], [0, 0, 1, 0], [], []>} : vector<16x32xbf16>, vector<16x32xbf16>, vector<16x16xf32> -> vector<16x16xf32>
    %cst_31 = arith.constant dense<0xFF800000> : vector<16xf32>
    %89 = vector.multi_reduction <maximumf>, %88, %cst_31 [1] : vector<16x16xf32> to vector<16xf32>
    %90 = vector.shape_cast %89 : vector<16xf32> to vector<16x1xf32>
    %91 = vector.broadcast %90 : vector<16x1xf32> to vector<16x16xf32>
    %92 = arith.subf %88, %91 : vector<16x16xf32>
    %93 = math.exp %92 : vector<16x16xf32>
    %cst_32 = arith.constant dense<0.000000e+00> : vector<16xf32>
    %94 = vector.multi_reduction <add>, %93, %cst_32 [1] : vector<16x16xf32> to vector<16xf32>
    %95 = vector.shape_cast %94 : vector<16xf32> to vector<16x1xf32>
    %96 = tpu.reciprocal %95 {approx = true} : vector<16x1xf32> -> vector<16x1xf32>
    %97 = vector.broadcast %96 : vector<16x1xf32> to vector<16x16xf32>
    %98 = arith.mulf %93, %97 : vector<16x16xf32>
    %99 = arith.truncf %98 : vector<16x16xf32> to vector<16x16xbf16>
    %cst_33 = arith.constant dense<0.000000e+00> : vector<16x32xf32>
    %100 = tpu.matmul %99, %87, %cst_33 {dimension_numbers = #tpu.dot_dimension_numbers<[1], [0], [0], [1], [0, 0, 1, 1], [], []>} : vector<16x16xbf16>, vector<16x32xbf16>, vector<16x32xf32> -> vector<16x32xf32>
    %101 = tpu.concatenate %52, %68, %84, %100 in 1 : vector<16x32xf32>, vector<16x32xf32>, vector<16x32xf32>, vector<16x32xf32> -> vector<16x128xf32>
    %102 = arith.truncf %101 : vector<16x128xf32> to vector<16x128xbf16>
    %c0_34 = arith.constant 0 : index
    %c0_35 = arith.constant 0 : index
    %103 = vector.load %arg6[%c0_34, %c0_35] : memref<128x128xbf16, #tpu.memory_space<vmem>>, vector<128x128xbf16>
    %cst_36 = arith.constant dense<0.000000e+00> : vector<16x128xf32>
    %104 = tpu.matmul %102, %103, %cst_36 {dimension_numbers = #tpu.dot_dimension_numbers<[1], [0], [0], [1], [0, 0, 1, 1], [], []>} : vector<16x128xbf16>, vector<128x128xbf16>, vector<16x128xf32> -> vector<16x128xf32>
    %105 = vector.broadcast %31 : vector<1x128xf32> to vector<16x128xf32>
    %106 = arith.addf %104, %105 : vector<16x128xf32>
    %107 = arith.addf %0, %106 : vector<16x128xf32>
    %cst_37 = arith.constant dense<0.000000e+00> : vector<16xf32>
    %108 = vector.multi_reduction <add>, %107, %cst_37 [1] : vector<16x128xf32> to vector<16xf32>
    %109 = vector.shape_cast %108 : vector<16xf32> to vector<16x1xf32>
    %cst_38 = arith.constant 1.280000e+02 : f32
    %110 = vector.broadcast %cst_38 : f32 to vector<16x1xf32>
    %111 = arith.divf %109, %110 : vector<16x1xf32>
    %112 = vector.broadcast %111 : vector<16x1xf32> to vector<16x128xf32>
    %113 = arith.subf %107, %112 : vector<16x128xf32>
    %114 = arith.mulf %113, %113 : vector<16x128xf32>
    %cst_39 = arith.constant dense<0.000000e+00> : vector<16xf32>
    %115 = vector.multi_reduction <add>, %114, %cst_39 [1] : vector<16x128xf32> to vector<16xf32>
    %116 = vector.shape_cast %115 : vector<16xf32> to vector<16x1xf32>
    %cst_40 = arith.constant 1.280000e+02 : f32
    %117 = vector.broadcast %cst_40 : f32 to vector<16x1xf32>
    %118 = arith.divf %116, %117 : vector<16x1xf32>
    %119 = vector.broadcast %111 : vector<16x1xf32> to vector<16x128xf32>
    %120 = arith.subf %107, %119 : vector<16x128xf32>
    %cst_41 = arith.constant 9.99999974E-6 : f32
    %121 = vector.broadcast %cst_41 : f32 to vector<16x1xf32>
    %122 = arith.addf %118, %121 : vector<16x1xf32>
    %123 = math.rsqrt %122 : vector<16x1xf32>
    %124 = vector.broadcast %123 : vector<16x1xf32> to vector<16x128xf32>
    %125 = arith.mulf %120, %124 : vector<16x128xf32>
    %126 = vector.broadcast %29 : vector<1x128xf32> to vector<16x128xf32>
    %127 = arith.mulf %125, %126 : vector<16x128xf32>
    %128 = vector.broadcast %30 : vector<1x128xf32> to vector<16x128xf32>
    %129 = arith.addf %127, %128 : vector<16x128xf32>
    %130 = arith.truncf %129 : vector<16x128xf32> to vector<16x128xbf16>
    %c0_42 = arith.constant 0 : index
    %c0_43 = arith.constant 0 : index
    %131 = vector.load %arg7[%c0_42, %c0_43] : memref<128x512xbf16, #tpu.memory_space<vmem>>, vector<128x512xbf16>
    %cst_44 = arith.constant dense<0.000000e+00> : vector<16x512xf32>
    %132 = tpu.matmul %130, %131, %cst_44 {dimension_numbers = #tpu.dot_dimension_numbers<[1], [0], [0], [1], [0, 0, 1, 1], [], []>} : vector<16x128xbf16>, vector<128x512xbf16>, vector<16x512xf32> -> vector<16x512xf32>
    %c0_45 = arith.constant 0 : index
    %c0_46 = arith.constant 0 : index
    %133 = vector.load %arg3[%c0_45, %c0_46] : memref<1x512xf32, #tpu.memory_space<vmem>>, vector<1x512xf32>
    %134 = vector.broadcast %133 : vector<1x512xf32> to vector<16x512xf32>
    %135 = arith.addf %132, %134 : vector<16x512xf32>
    %cst_47 = arith.constant 0.000000e+00 : f32
    %136 = vector.broadcast %cst_47 : f32 to vector<16x512xf32>
    %137 = arith.maximumf %135, %136 : vector<16x512xf32>
    %138 = arith.truncf %137 : vector<16x512xf32> to vector<16x512xbf16>
    %c0_48 = arith.constant 0 : index
    %c0_49 = arith.constant 0 : index
    %139 = vector.load %arg8[%c0_48, %c0_49] : memref<512x128xbf16, #tpu.memory_space<vmem>>, vector<512x128xbf16>
    %cst_50 = arith.constant dense<0.000000e+00> : vector<16x128xf32>
    %140 = tpu.matmul %138, %139, %cst_50 {dimension_numbers = #tpu.dot_dimension_numbers<[1], [0], [0], [1], [0, 0, 1, 1], [], []>} : vector<16x512xbf16>, vector<512x128xbf16>, vector<16x128xf32> -> vector<16x128xf32>
    %141 = vector.broadcast %32 : vector<1x128xf32> to vector<16x128xf32>
    %142 = arith.addf %140, %141 : vector<16x128xf32>
    %143 = arith.addf %107, %142 : vector<16x128xf32>
    %c0_51 = arith.constant 0 : index
    %c0_52 = arith.constant 0 : index
    %144 = vector.load %arg9[%c0_51, %c0_52] : memref<16x128xf32, #tpu.memory_space<vmem>>, vector<16x128xf32>
    tpu.vector_store %arg9[%c0_51, %c0_52], %143 {strides = array<i32>} : memref<16x128xf32, #tpu.memory_space<vmem>>, vector<16x128xf32>,
    return
  }
  func.func @transform_0(%arg0: i32) -> (i32, i32) {
    %c0_i32 = arith.constant 0 : i32
    %c0_i32_0 = arith.constant 0 : i32
    return %arg0, %c0_i32 : i32, i32
  }
  func.func @transform_1(%arg0: i32) -> (i32, i32) {
    %c0_i32 = arith.constant 0 : i32
    %c0_i32_0 = arith.constant 0 : i32
    %c0_i32_1 = arith.constant 0 : i32
    return %c0_i32, %c0_i32_0 : i32, i32
  }
  func.func @transform_2(%arg0: i32) -> (i32, i32) {
    %c0_i32 = arith.constant 0 : i32
    %c0_i32_0 = arith.constant 0 : i32
    %c0_i32_1 = arith.constant 0 : i32
    return %c0_i32, %c0_i32_0 : i32, i32
  }
  func.func @transform_3(%arg0: i32) -> (i32, i32) {
    %c0_i32 = arith.constant 0 : i32
    %c0_i32_0 = arith.constant 0 : i32
    %c0_i32_1 = arith.constant 0 : i32
    return %c0_i32, %c0_i32_0 : i32, i32
  }
  func.func @transform_4(%arg0: i32) -> (i32, i32) {
    %c0_i32 = arith.constant 0 : i32
    %c0_i32_0 = arith.constant 0 : i32
    %c0_i32_1 = arith.constant 0 : i32
    return %c0_i32, %c0_i32_0 : i32, i32
  }
  func.func @transform_5(%arg0: i32) -> (i32, i32) {
    %c0_i32 = arith.constant 0 : i32
    %c0_i32_0 = arith.constant 0 : i32
    %c0_i32_1 = arith.constant 0 : i32
    return %c0_i32, %c0_i32_0 : i32, i32
  }
  func.func @transform_6(%arg0: i32) -> (i32, i32) {
    %c0_i32 = arith.constant 0 : i32
    %c0_i32_0 = arith.constant 0 : i32
    %c0_i32_1 = arith.constant 0 : i32
    return %c0_i32, %c0_i32_0 : i32, i32
  }
  func.func @transform_7(%arg0: i32) -> (i32, i32) {
    %c0_i32 = arith.constant 0 : i32
    %c0_i32_0 = arith.constant 0 : i32
    %c0_i32_1 = arith.constant 0 : i32
    return %c0_i32, %c0_i32_0 : i32, i32
  }
  func.func @transform_8(%arg0: i32) -> (i32, i32) {
    %c0_i32 = arith.constant 0 : i32
    %c0_i32_0 = arith.constant 0 : i32
    return %arg0, %c0_i32 : i32, i32
  }
}

</mosaic_0001>

<bundles_post_ra>
// kernel: tpu_custom_call.1
= control target key start
LH: loop header
LB: loop body
LE: loop exit
PB: predicated region body
PF: predicated region fallthrough
CT: control target
= control target key end

     0   :  { %13 = vsyncpa [#allocation3], 0  ;;  %s2732_s0 = inlined_call_operand.hbm [shape: f32[16,128], index: 0, kind: input, shape index: {}]   ;;  %s2733_s1 = inlined_call_operand.hbm [shape: f32[6,128], index: 1, kind: input, shape index: {}]   ;;  %s2734_s2 = inlined_call_operand.vmem [shape: f32[1,512], index: 2, kind: input, shape index: {}]   ;;  %s2735_s3 = inlined_call_operand.hbm [shape: bf16[128,128], index: 3, kind: input, shape index: {}]   ;;  %s2736_s4 = inlined_call_operand.hbm [shape: bf16[128,256], index: 4, kind: input, shape index: {}]   ;;  %s2737_s5 = inlined_call_operand.hbm [shape: bf16[128,128], index: 5, kind: input, shape index: {}]   ;;  %s2738_s6 = inlined_call_operand.hbm [shape: bf16[128,512], index: 6, kind: input, shape index: {}]   ;;  %s2739_s7 = inlined_call_operand.hbm [shape: bf16[512,128], index: 7, kind: input, shape index: {}]   ;;  %s2740_s8 = inlined_call_operand.hbm [shape: f32[16,128], index: 8, kind: output, shape index: {}]  }
   0x1   :  { %14 = vsyncpa [#allocation6], 0 }
   0x2   :  { %15 = vsyncpa [#allocation9], 0 }
   0x3   :  { %16 = vsyncpa [#allocation12], 0 }
   0x4   :  { %17 = vsyncpa [#allocation4], 0  ;;  %s2410_s27 = smov [#allocation5]   ;;  %s2224_s9 = scalar_lea.hbm %s2733_s1, 128 }
   0x5   :  { %s36_s28 = sshll.u32 %s2410_s27, 4  ;;  %p2225_p0 = scmp.ne.s32.totalorder %s2733_s1, %s2224_s9  ;;  %s37_s28 = int_to_ptr.vmem [resolvable:$true] %s36_s28 }
   0x6   :  { %p2228_p1 = scmp.lt.u32.totalorder %s2224_s9, %s2733_s1 }
   0x8   :  { %p2230_p2 = pnand %p2228_p1, %p2225_p0 }
   0xa   :  { %2233 = shalt.err (!%p2230_p2)
}
   0xb   :  { %s2234_s14 = scalar_lea.vmem %s37_s28, 128  ;;  %p2239_p4 = scmp.lt.s32.totalorder %s37_s28, %s37_s28 }
   0xc   :  { %p2235_p3 = scmp.ne.s32.totalorder %s37_s28, %s2234_s14  ;;  %p2240_p5 = scmp.lt.s32.totalorder %s2234_s14, %s2234_s14 }
   0xe   :  { %p2241_p6 = por %p2240_p5, %p2239_p4 }
  0x10   :  { %p2242_p7 = pnand %p2241_p6, %p2235_p3 }
  0x12   :  { %2245 = shalt.err (!%p2242_p7)
}
  0x13   :  { %39 = dma.hbm_to_vmem [thread:$0]  %s2733_s1, 128, %s37_s28, [#allocation6]  }
  0x14   :  { %s2411_s17 = smov [#allocation8]   ;;  %s2412_s19 = smov [#allocation11]  }
  0x15   :  { %s59_s18 = sshll.u32 %s2411_s17, 4  ;;  %s83_s20 = sshll.u32 %s2412_s19, 4  ;;  %s60_s18 = int_to_ptr.vmem [resolvable:$true] %s59_s18  ;;  %s84_s20 = int_to_ptr.vmem [resolvable:$true] %s83_s20 }
  0x16   :  { %s2246_s23 = scalar_lea.hbm %s2736_s4, 2048 }
  0x17   :  { %p2247_p8 = scmp.ne.s32.totalorder %s2736_s4, %s2246_s23  ;;  %p2250_p9 = scmp.lt.u32.totalorder %s2246_s23, %s2736_s4 }
  0x19   :  { %p2252_p10 = pnand %p2250_p9, %p2247_p8 }
  0x1b   :  { %2255 = shalt.err (!%p2252_p10)
}
  0x1c   :  { %s2256_s1 = scalar_lea.vmem %s60_s18, 2048  ;;  %p2261_p12 = scmp.lt.s32.totalorder %s60_s18, %s60_s18 }
  0x1d   :  { %p2257_p11 = scmp.ne.s32.totalorder %s60_s18, %s2256_s1  ;;  %p2262_p13 = scmp.lt.s32.totalorder %s2256_s1, %s2256_s1 }
  0x1f   :  { %p2263_p0 = por %p2262_p13, %p2261_p12 }
  0x21   :  { %p2264_p1 = pnand %p2263_p0, %p2257_p11 }
  0x23   :  { %2267 = shalt.err (!%p2264_p1)
}
  0x24   :  { %s2413_s28 = smov 128   ;;  %s2414_s29 = smov 8  }
  0x25   :  { %65 = dma.hbm_to_vmem [thread:$0]  %s2736_s4, 2048, %s60_s18, [#allocation9], %s2413_s28, %s2413_s28, %s2414_s29  }
  0x26   :  { %s2268_s12 = scalar_lea.hbm %s2738_s6, 4096 }
  0x27   :  { %p2269_p2 = scmp.ne.s32.totalorder %s2738_s6, %s2268_s12  ;;  %p2272_p3 = scmp.lt.u32.totalorder %s2268_s12, %s2738_s6 }
  0x29   :  { %p2274_p4 = pnand %p2272_p3, %p2269_p2 }
  0x2b   :  { %2277 = shalt.err (!%p2274_p4)
}
  0x2c   :  { %s2278_s17 = scalar_lea.vmem %s84_s20, 4096  ;;  %p2283_p6 = scmp.lt.s32.totalorder %s84_s20, %s84_s20 }
  0x2d   :  { %p2279_p5 = scmp.ne.s32.totalorder %s84_s20, %s2278_s17  ;;  %p2284_p7 = scmp.lt.s32.totalorder %s2278_s17, %s2278_s17 }
  0x2f   :  { %p2285_p8 = por %p2284_p7, %p2283_p6 }
  0x31   :  { %p2286_p9 = pnand %p2285_p8, %p2279_p5 }
  0x33   :  { %2289 = shalt.err (!%p2286_p9)
}
  0x34   :  { %s2415_s4 = smov 256   ;;  %s2416_s18 = smov 16  }
  0x35   :  { %89 = dma.hbm_to_vmem [thread:$0]  %s2738_s6, 4096, %s84_s20, [#allocation12], %s2415_s4, %s2415_s4, %s2416_s18  }
  0x36   :  { %s2417_s22 = smov [#allocation2]   ;;  %s2418_s24 = smov [#allocation7]  }
  0x37   :  { %s23_s23 = sshll.u32 %s2417_s22, 4  ;;  %s47_s25 = sshll.u32 %s2418_s24, 4  ;;  %s24_s23 = int_to_ptr.vmem [resolvable:$true] %s23_s23  ;;  %s48_s25 = int_to_ptr.vmem [resolvable:$true] %s47_s25 }
  0x38   :  { %s2290_s1 = scalar_lea.hbm %s2732_s0, 256 }
  0x39   :  { %p2291_p10 = scmp.ne.s32.totalorder %s2732_s0, %s2290_s1  ;;  %p2294_p11 = scmp.lt.u32.totalorder %s2290_s1, %s2732_s0 }
  0x3b   :  { %p2296_p12 = pnand %p2294_p11, %p2291_p10 }
  0x3d   :  { %2299 = shalt.err (!%p2296_p12)
}
  0x3e   :  { %s2300_s6 = scalar_lea.vmem %s24_s23, 256  ;;  %p2305_p0 = scmp.lt.s32.totalorder %s24_s23, %s24_s23 }
  0x3f   :  { %p2301_p13 = scmp.ne.s32.totalorder %s24_s23, %s2300_s6  ;;  %p2306_p1 = scmp.lt.s32.totalorder %s2300_s6, %s2300_s6 }
  0x41   :  { %p2307_p2 = por %p2306_p1, %p2305_p0 }
  0x43   :  { %p2308_p3 = pnand %p2307_p2, %p2301_p13 }
  0x45   :  { %2311 = shalt.err (!%p2308_p3)
}
  0x46   :  { %29 = dma.hbm_to_vmem [thread:$0]  %s2732_s0, 256, %s24_s23, [#allocation3], %s2413_s28, %s2413_s28, %s2414_s29  }
  0x47   :  { %s2312_s15 = scalar_lea.hbm %s2735_s3, 1024 }
  0x48   :  { %p2313_p4 = scmp.ne.s32.totalorder %s2735_s3, %s2312_s15  ;;  %p2316_p5 = scmp.lt.u32.totalorder %s2312_s15, %s2735_s3 }
  0x4a   :  { %p2318_p6 = pnand %p2316_p5, %p2313_p4 }
  0x4c   :  { %2321 = shalt.err (!%p2318_p6)
}
  0x4d   :  { %s2322_s19 = scalar_lea.vmem %s48_s25, 1024  ;;  %p2327_p8 = scmp.lt.s32.totalorder %s48_s25, %s48_s25 }
  0x4e   :  { %p2323_p7 = scmp.ne.s32.totalorder %s48_s25, %s2322_s19  ;;  %p2328_p9 = scmp.lt.s32.totalorder %s2322_s19, %s2322_s19 }
  0x50   :  { %p2329_p10 = por %p2328_p9, %p2327_p8 }
  0x52   :  { %p2330_p11 = pnand %p2329_p10, %p2323_p7 }
  0x54   :  { %2333 = shalt.err (!%p2330_p11)
}
  0x55   :  { %s2419_s0 = smov 64   ;;  %s2420_s21 = smov 4  }
  0x56   :  { %53 = dma.hbm_to_vmem [thread:$0]  %s2735_s3, 1024, %s48_s25, [#allocation6], %s2419_s0, %s2419_s0, %s2420_s21  }
  0x57   :  { %s2421_s24 = smov [#allocation10]   ;;  %s2422_s27 = smov [#allocation13]  }
  0x58   :  { %s71_s26 = sshll.u32 %s2421_s24, 4  ;;  %s95_s1 = sshll.u32 %s2422_s27, 4  ;;  %s72_s26 = int_to_ptr.vmem [resolvable:$true] %s71_s26  ;;  %s96_s1 = int_to_ptr.vmem [resolvable:$true] %s95_s1 }
  0x59   :  { %s2334_s10 = scalar_lea.hbm %s2737_s5, 1024 }
  0x5a   :  { %p2335_p12 = scmp.ne.s32.totalorder %s2737_s5, %s2334_s10  ;;  %p2338_p13 = scmp.lt.u32.totalorder %s2334_s10, %s2737_s5 }
  0x5c   :  { %p2340_p0 = pnand %p2338_p13, %p2335_p12 }
  0x5e   :  { %2343 = shalt.err (!%p2340_p0)
}
  0x5f   :  { %s2344_s3 = scalar_lea.vmem %s72_s26, 1024  ;;  %p2349_p2 = scmp.lt.s32.totalorder %s72_s26, %s72_s26 }
  0x60   :  { %p2345_p1 = scmp.ne.s32.totalorder %s72_s26, %s2344_s3  ;;  %p2350_p3 = scmp.lt.s32.totalorder %s2344_s3, %s2344_s3 }
  0x62   :  { %p2351_p4 = por %p2350_p3, %p2349_p2 }
  0x64   :  { %p2352_p5 = pnand %p2351_p4, %p2345_p1 }
  0x66   :  { %2355 = shalt.err (!%p2352_p5)
}
  0x67   :  { %77 = dma.hbm_to_vmem [thread:$0]  %s2737_s5, 1024, %s72_s26, [#allocation9], %s2419_s0, %s2419_s0, %s2420_s21  }
  0x68   :  { %s2356_s16 = scalar_lea.hbm %s2739_s7, 4096 }
  0x69   :  { %p2357_p6 = scmp.ne.s32.totalorder %s2739_s7, %s2356_s16  ;;  %p2360_p7 = scmp.lt.u32.totalorder %s2356_s16, %s2739_s7 }
  0x6b   :  { %p2362_p8 = pnand %p2360_p7, %p2357_p6 }
  0x6d   :  { %2365 = shalt.err (!%p2362_p8)
}
  0x6e   :  { %s2366_s22 = scalar_lea.vmem %s96_s1, 4096  ;;  %p2371_p10 = scmp.lt.s32.totalorder %s96_s1, %s96_s1 }
  0x6f   :  { %p2367_p9 = scmp.ne.s32.totalorder %s96_s1, %s2366_s22  ;;  %p2372_p11 = scmp.lt.s32.totalorder %s2366_s22, %s2366_s22 }
  0x71   :  { %p2373_p12 = por %p2372_p11, %p2371_p10 }
  0x73   :  { %p2374_p13 = pnand %p2373_p12, %p2367_p9 }
  0x75   :  { %2377 = shalt.err (!%p2374_p13)
}
  0x76   :  { %101 = dma.hbm_to_vmem [thread:$0]  %s2739_s7, 4096, %s96_s1, [#allocation12], %s2419_s0, %s2419_s0, %s2420_s21  }
  0x77   :  { %2400 = dma.done.wait [#allocation3], 256  }
  0x78   :  { %2401 = vsyncadd [#allocation3], 4294967040 }
  0x79   :  { %2402 = dma.done.wait [#allocation6], 1152  }
  0x7a   :  { %2403 = vsyncadd [#allocation6], 4294966144 }
  0x7b   :  { %2404 = dma.done.wait [#allocation9], 3072  }
  0x7c   :  { %2405 = vsyncadd [#allocation9], 4294964224 }
  0x7d   :  { %2406 = dma.done.wait [#allocation12], 8192  }
  0x7e   :  { %2407 = vsyncadd [#allocation12], 4294959104  ;;  %v2573_v0 = vld [vmem:[#allocation2] sm:$0xff]  ;;  %v2575_v1 = vld [vmem:[#allocation2 + $0x8] sm:$0xff]  ;;  %v2423_v5 = vmov 0.0   ;;  %v2424_v27 = vmov 0  }
  0x7f   :  { %128 = vadd.xlane.f32.xlu0 %v2573_v0  ;;  %v2064_v2 = vld [vmem:[#allocation8 + $0x4] ss:$8 sps:$4 sm:$0xff]   ;;  %v2066_v3 = vld [vmem:[#allocation8] ss:$8 sps:$4 sm:$0xff]   ;;  %1942 = vmatprep.subr.bf16.mxu1 %v2423_v5  ;;  %v2068_v6 = vld [vmem:[#allocation8 + $0x14] ss:$8 sps:$4 sm:$0xff]  }
  0x80   :  { %v2067_v4 = vld [vmem:[#allocation7] sm:$0xff]   ;;  %260 = vmatprep.subr.bf16.mxu0 %v2064_v2  ;;  %v2070_v15 = vld [vmem:[#allocation8 + $0x10] ss:$8 sps:$4 sm:$0xff]   ;;  %v2071_v16 = vld [vmem:[#allocation7 + $0x8] sm:$0xff]   ;;  %292 = vmatprep.mubr.bf16.mxu0 %v2424_v27  ;;  %vm2425_vm0 = vmmov 0   ;;  %vm415_vm1 = vcmask 261120  }
  0x81   :  { %1943 = vmatpush3.bf16.msra.mxu1 %v2067_v4  ;;  %261 = vmatpush1.bf16.msra.mxu0 %v2066_v3  ;;  %v2072_v17 = vld [vmem:[#allocation8 + $0x24] ss:$8 sps:$4 sm:$0xff]   ;;  %v2074_v18 = vld [vmem:[#allocation8 + $0x20] ss:$8 sps:$4 sm:$0xff]   ;;  %v2075_v19 = vld [vmem:[#allocation7 + $0x10] sm:$0xff]   ;;  %vm463_vm2 = vcmask 130048  }
  0x82   :  { %1944 = vmatprep.subr.bf16.mxu1 %v2423_v5  ;;  %262 = vmatprep.subr.bf16.mxu0 %v2068_v6  ;;  %v2076_v20 = vld [vmem:[#allocation8 + $0x34] ss:$8 sps:$4 sm:$0xff]   ;;  %v2078_v21 = vld [vmem:[#allocation8 + $0x30] ss:$8 sps:$4 sm:$0xff]   ;;  %v2080_v23 = vld [vmem:[#allocation8 + $0x44] ss:$8 sps:$4 sm:$0xff]  }
  0x83   :  { %130 = vadd.xlane.f32.xlu0 %v2575_v1  ;;  %v2079_v22 = vld [vmem:[#allocation7 + $0x18] sm:$0xff]   ;;  %v2082_v24 = vld [vmem:[#allocation8 + $0x40] ss:$8 sps:$4 sm:$0xff]   ;;  %1958 = vmatprep.mubr.msk.bf16.mxu1 %vm2425_vm0, %v2423_v5  ;;  %v2088_v30 = vld [vmem:[#allocation8 + $0x64] ss:$8 sps:$4 sm:$0xff]   ;;  %s2426_s7 = smov 96  }
  0x84   :  { %v2083_v25 = vld [vmem:[#allocation7 + $0x20] sm:$0xff]   ;;  %v2084_v26 = vld [vmem:[#allocation8 + $0x54] ss:$8 sps:$4 sm:$0xff]   ;;  %v2086_v28 = vld [vmem:[#allocation8 + $0x50] ss:$8 sps:$4 sm:$0xff]   ;;  %s2427_s21 = smov 32  }
  0x85   :  { %263 = vmatpush1.bf16.msra.mxu0 %v2070_v15  ;;  %1945 = vmatpush3.bf16.msra.mxu1 %v2071_v16  ;;  %v2087_v29 = vld [vmem:[#allocation7 + $0x28] sm:$0xff]   ;;  %v2091_v32 = vld [vmem:[#allocation7 + $0x30] sm:$0xff]   ;;  %v2095_v35 = vld [vmem:[#allocation7 + $0x38] sm:$0xff]   ;;  %vm923_vm3 = vcmask 523264   ;;  %vm926_vm4 = vcmask 785408  }
  0x86   :  { %1946 = vmatprep.subr.bf16.mxu1 %v2423_v5  ;;  %264 = vmatprep.subr.bf16.mxu0 %v2072_v17  ;;  %v2090_v31 = vld [vmem:[#allocation8 + $0x60] ss:$8 sps:$4 sm:$0xff]   ;;  %v2092_v33 = vld [vmem:[#allocation8 + $0x74] ss:$8 sps:$4 sm:$0xff]   ;;  %v2094_v34 = vld [vmem:[#allocation8 + $0x70] ss:$8 sps:$4 sm:$0xff]  }
  0x87   :  { %v1754_v44 = vld [vmem:[#allocation5] ss:$0 sm:$0xff]  ;;  %v1755_v48 = vld [vmem:[#allocation5 + $0x1] ss:$0 sm:$0xff] }
  0x89   :  { %265 = vmatpush1.bf16.msra.mxu0 %v2074_v18  ;;  %1947 = vmatpush3.bf16.msra.mxu1 %v2075_v19 }
  0x8a   :  { %1948 = vmatprep.subr.bf16.mxu1 %v2423_v5  ;;  %266 = vmatprep.subr.bf16.mxu0 %v2076_v20 }
  0x8d   :  { %267 = vmatpush1.bf16.msra.mxu0 %v2078_v21  ;;  %1949 = vmatpush3.bf16.msra.mxu1 %v2079_v22 }
  0x8e   :  { %1950 = vmatprep.subr.bf16.mxu1 %v2423_v5  ;;  %268 = vmatprep.subr.bf16.mxu0 %v2080_v23 }
  0x91   :  { %269 = vmatpush1.bf16.msra.mxu0 %v2082_v24  ;;  %1951 = vmatpush3.bf16.msra.mxu1 %v2083_v25 }
  0x92   :  { %270 = vmatprep.subr.bf16.mxu0 %v2084_v26  ;;  %1952 = vmatprep.subr.bf16.mxu1 %v2423_v5 }
  0x95   :  { %271 = vmatpush1.bf16.msra.mxu0 %v2086_v28  ;;  %1953 = vmatpush3.bf16.msra.mxu1 %v2087_v29 }
  0x96   :  { %272 = vmatprep.subr.bf16.mxu0 %v2088_v30  ;;  %1954 = vmatprep.subr.bf16.mxu1 %v2423_v5 }
  0x99   :  { %273 = vmatpush1.bf16.msra.mxu0 %v2090_v31  ;;  %1955 = vmatpush3.bf16.msra.mxu1 %v2091_v32 }
  0x9a   :  { %274 = vmatprep.subr.bf16.mxu0 %v2092_v33  ;;  %1956 = vmatprep.subr.bf16.mxu1 %v2423_v5 }
  0x9d   :  { %275 = vmatpush1.bf16.msra.mxu0 %v2094_v34  ;;  %1957 = vmatpush3.bf16.msra.mxu1 %v2095_v35 }
  0x9e   :  { %1962 = vmatprep.subr.bf16.mxu1 %v2423_v5  ;;  %1986 = vmatprep.subr.bf16.mxu0 %v2423_v5 }
 0x10c   :  { %v129_v7 = vpop.xlane.xlu0 %128 }
 0x10d   :  { %v133_v8 = vmul.f32 0.0078125, %v129_v7 }
 0x10f   :  { %v2582_v9 = vsub.f32 %v2573_v0, %v133_v8 }
 0x110   :  { %v131_v10 = vpop.xlane.xlu0 %130 }
 0x111   :  { %v134_v11 = vmul.f32 0.0078125, %v131_v10  ;;  %v137_v12 = vmul.f32 %v2582_v9, %v2582_v9 }
 0x113   :  { %v2587_v13 = vsub.f32 %v2575_v1, %v134_v11  ;;  %139 = vadd.xlane.f32.xlu1 %v137_v12 }
 0x115   :  { %v138_v14 = vmul.f32 %v2587_v13, %v2587_v13 }
 0x117   :  { %141 = vadd.xlane.f32.xlu1 %v138_v14 }
 0x1a0   :  { %v140_v36 = vpop.xlane.xlu1 %139 }
 0x1a1   :  { %v143_v37 = vmul.f32 0.0078125, %v140_v36 }
 0x1a3   :  { %v145_v38 = vadd.f32 1e-05, %v143_v37 }
 0x1a4   :  { %v142_v39 = vpop.xlane.xlu1 %141 }
 0x1a5   :  { %2184 = vrsqrt.f32 %v145_v38  ;;  %v144_v40 = vmul.f32 0.0078125, %v142_v39 }
 0x1a7   :  { %v146_v41 = vadd.f32 1e-05, %v144_v40 }
 0x1a9   :  { %2186 = vrsqrt.f32 %v146_v41 }
 0x1af   :  { %v2185_v42 = vpop.eup %2184 }
 0x1b0   :  { %v149_v43 = vmul.f32 %v2185_v42, %v2582_v9 }
 0x1b2   :  { %v155_v47 = vmul.f32 %v1754_v44, %v149_v43 }
 0x1b3   :  { %v2187_v45 = vpop.eup %2186 }
 0x1b4   :  { %v150_v46 = vmul.f32 %v2187_v45, %v2587_v13  ;;  %v161_v50 = vadd.f32 %v1755_v48, %v155_v47 }
 0x1b6   :  { %v156_v49 = vmul.f32 %v1754_v44, %v150_v46 }
 0x1b8   :  { %v162_v51 = vadd.f32 %v1755_v48, %v156_v49 }
 0x1ba   :  { %v163_v52 = vpack.c.bf16 %v162_v51, %v161_v50 }
 0x1bc   :  { %293 = vmatmul.mubr.bf16.vlgmr.msra.gmra.mrb[0].mxu0 %v163_v52  ;;  %1959 = vmatmul.mubr.bf16.vlgmr.msra.gmra.mrb[0].mxu1 %v163_v52 }
 0x1bd   :  { %1964 = vmatprep.mubr.msk.bf16.mxu1 %vm2425_vm0, %v2423_v5  ;;  %1988 = vmatprep.mubr.msk.bf16.mxu0 %vm2425_vm0, %v2423_v5 }
 0x28f   :  { %v294_v53 = vpop.f32.mrb[0].mxu0  ;;  %v407_v54 = vpop.f32.mrb[0].mxu1 }
 0x290   :  { %v296_v55 = vpop.f32.mrb[1].mxu0  ;;  %v1960_v56 = vpop.f32.mrb[1].mxu1 }
 0x291   :  { %v298_v57 = vpop.f32.mrb[2].mxu0  ;;  %v410_v58 = vpop.f32.mrb[2].mxu1 }
 0x292   :  { %v303_v59 = vpack.c.bf16 %v298_v57, %v294_v53  ;;  %v414_v60 = vpack.c.bf16 %v410_v58, %v407_v54  ;;  %v300_v61 = vpop.f32.mrb[3].mxu0  ;;  %v1961_v62 = vpop.f32.mrb[3].mxu1 }
 0x293   :  { %v2608_v63 = vpack.c.bf16 %v300_v61, %v296_v55 }
 0x294   :  { %v420_v2 = vsel %vm415_vm1, %v303_v59, 0 }
 0x295   :  { %1963 = vmatpush3.bf16.xpose.msra.mxu1 %v420_v2 }
 0x296   :  { %1968 = vmatprep.subr.bf16.mxu1 %v2423_v5 }
 0x29c   :  { %1965 = vmatmul.mubr.msk.bf16.vlgmr.msra.gmra.mrb[4].mxu1 %vm415_vm1, %v414_v60 }
 0x29d   :  { %1969 = vmatpush3.bf16.msra.mxu1 %v2608_v63  ;;  %1970 = vmatprep.mubr.msk.bf16.mxu1 %vm2425_vm0, %v2423_v5 }
 0x29e   :  { %1974 = vmatprep.subr.bf16.mxu1 %v2423_v5 }
 0x36f   :  { %v456_v3 = vpop.f32.mrb[4].mxu1 }
 0x370   :  { %v1966_v4 = vpop.f32.mrb[5].mxu1  ;;  %v464_v6 = vsel %vm463_vm2, %v456_v3, -inf }
 0x371   :  { %465 = vmax.xlane.f32.xlu0 %v464_v6  ;;  %v459_v7 = vpop.f32.mrb[6].mxu1 }
 0x372   :  { %v1967_v8 = vpop.f32.mrb[7].mxu1  ;;  %v467_v9 = vsel %vm463_vm2, %v459_v7, -inf }
 0x373   :  { %468 = vmax.xlane.f32.xlu1 %v467_v9 }
 0x3fe   :  { %v466_v10 = vpop.xlane.xlu0 %465 }
 0x3ff   :  { %v470_v11 = vsub.f32 %v456_v3, %v466_v10 }
 0x400   :  { %v469_v12 = vpop.xlane.xlu1 %468 }
 0x401   :  { %v472_v13 = vmul.f32 1.442695, %v470_v11  ;;  %v471_v14 = vsub.f32 %v459_v7, %v469_v12 }
 0x403   :  { %2188 = vpow2.f32 %v472_v13  ;;  %v474_v15 = vmul.f32 1.442695, %v471_v14 }
 0x405   :  { %2190 = vpow2.f32 %v474_v15 }
 0x40d   :  { %v2189_v16 = vpop.eup %2188 }
 0x40e   :  { %v476_v17 = vsel %vm463_vm2, %v2189_v16, 0.0 }
 0x40f   :  { %v2191_v18 = vpop.eup %2190  ;;  %477 = vadd.xlane.f32.xlu0 %v476_v17 }
 0x410   :  { %v479_v19 = vsel %vm463_vm2, %v2191_v18, 0.0 }
 0x411   :  { %480 = vadd.xlane.f32.xlu1 %v479_v19 }
 0x422   :  { %532 = vrot.lane.b32.xlu1 %v414_v60, %s2426_s7 }
 0x425   :  { %535 = vrot.lane.b32.xlu0 %v303_v59, %s2426_s7 }
 0x426   :  { %657 = vrot.lane.b32.xlu1 %v303_v59, %s2419_s0 }
 0x429   :  { %778 = vrot.lane.b32.xlu0 %v303_v59, %s2427_s21 }
 0x42a   :  { %655 = vrot.lane.b32.xlu1 %v414_v60, %s2419_s0 }
 0x42e   :  { %776 = vrot.lane.b32.xlu1 %v414_v60, %s2427_s21 }
 0x49c   :  { %v478_v20 = vpop.xlane.xlu0 %477 }
 0x49d   :  { %2192 = vrcp.f32 %v478_v20 }
 0x49e   :  { %v481_v21 = vpop.xlane.xlu1 %480 }
 0x49f   :  { %2194 = vrcp.f32 %v481_v21 }
 0x4a0   :  { %v536_v23 = vpop.permute.xlu0 %535 }
 0x4a1   :  { %v541_v33 = vsel %vm415_vm1, %v536_v23, 0 }
 0x4a2   :  { %v533_v22 = vpop.permute.xlu1 %532 }
 0x4a4   :  { %v779_v31 = vpop.permute.xlu0 %778 }
 0x4a5   :  { %v784_v35 = vsel %vm415_vm1, %v779_v31, 0 }
 0x4a6   :  { %v658_v24 = vpop.permute.xlu1 %657 }
 0x4a7   :  { %v2193_v25 = vpop.eup %2192  ;;  %v663_v26 = vsel %vm415_vm1, %v658_v24, 0 }
 0x4a8   :  { %1987 = vmatpush3.bf16.xpose.msra.mxu0 %v663_v26  ;;  %v484_v29 = vmul.f32 %v2193_v25, %v2189_v16 }
 0x4a9   :  { %v2195_v28 = vpop.eup %2194  ;;  %1998 = vmatprep.subr.bf16.mxu0 %v2423_v5 }
 0x4aa   :  { %v485_v30 = vmul.f32 %v2195_v28, %v2191_v18  ;;  %v656_v34 = vpop.permute.xlu1 %655 }
 0x4ac   :  { %v486_v32 = vpack.c.bf16 %v485_v30, %v484_v29 }
 0x4ae   :  { %1971 = vmatmul.mubr.msk.bf16.vlgmr.msra.gmra.mrb[8].mxu1 %vm463_vm2, %v486_v32  ;;  %v777_v36 = vpop.permute.xlu1 %776 }
 0x4af   :  { %1975 = vmatpush3.bf16.xpose.msra.mxu1 %v541_v33  ;;  %1989 = vmatmul.mubr.msk.bf16.vlgmr.msra.gmra.mrb[4].mxu0 %vm415_vm1, %v656_v34 }
 0x4b0   :  { %1999 = vmatpush3.bf16.xpose.msra.mxu0 %v784_v35  ;;  %1976 = vmatprep.mubr.msk.bf16.mxu1 %vm2425_vm0, %v2423_v5 }
 0x4b1   :  { %2000 = vmatprep.mubr.msk.bf16.mxu0 %vm2425_vm0, %v2423_v5  ;;  %1980 = vmatprep.subr.bf16.mxu1 %v2423_v5 }
 0x4b2   :  { %2010 = vmatprep.subr.bf16.mxu0 %v2423_v5 }
 0x4b6   :  { %1977 = vmatmul.mubr.msk.bf16.vlgmr.msra.gmra.mrb[12].mxu1 %vm415_vm1, %v533_v22 }
 0x4b7   :  { %2001 = vmatmul.mubr.msk.bf16.vlgmr.msra.gmra.mrb[8].mxu0 %vm415_vm1, %v777_v36  ;;  %1982 = vmatprep.mubr.msk.bf16.mxu1 %vm2425_vm0, %v2423_v5 }
 0x4b8   :  { %2026 = vmatprep.mubr.msk.bf16.mxu0 %vm2425_vm0, %v2423_v5 }
 0x581   :  { %v2645_v37 = vpop.f32.mrb[8].mxu1 }
 0x582   :  { %v1972_v38 = vpop.f32.mrb[9].mxu1  ;;  %v699_v39 = vpop.f32.mrb[4].mxu0 }
 0x583   :  { %v2647_v40 = vpop.f32.mrb[10].mxu1  ;;  %v1990_v41 = vpop.f32.mrb[5].mxu0  ;;  %v706_v55 = vsel %vm463_vm2, %v699_v39, -inf }
 0x584   :  { %v1973_v42 = vpop.f32.mrb[11].mxu1  ;;  %v702_v43 = vpop.f32.mrb[6].mxu0 }
 0x585   :  { %v1991_v44 = vpop.f32.mrb[7].mxu0  ;;  %v709_v57 = vsel %vm463_vm2, %v702_v43, -inf }
 0x589   :  { %v577_v45 = vpop.f32.mrb[12].mxu1 }
 0x58a   :  { %v1978_v46 = vpop.f32.mrb[13].mxu1  ;;  %v820_v47 = vpop.f32.mrb[8].mxu0  ;;  %v584_v48 = vsel %vm463_vm2, %v577_v45, -inf }
 0x58b   :  { %v2002_v49 = vpop.f32.mrb[9].mxu0  ;;  %585 = vmax.xlane.f32.xlu0 %v584_v48  ;;  %v580_v50 = vpop.f32.mrb[14].mxu1  ;;  %v827_v58 = vsel %vm463_vm2, %v820_v47, -inf }
 0x58c   :  { %v1979_v51 = vpop.f32.mrb[15].mxu1  ;;  %v823_v52 = vpop.f32.mrb[10].mxu0  ;;  %v587_v53 = vsel %vm463_vm2, %v580_v50, -inf }
 0x58d   :  { %v2003_v54 = vpop.f32.mrb[11].mxu0  ;;  %588 = vmax.xlane.f32.xlu1 %v587_v53  ;;  %v830_v56 = vsel %vm463_vm2, %v823_v52, -inf }
 0x58f   :  { %707 = vmax.xlane.f32.xlu0 %v706_v55  ;;  %v2096_v55 = vld [vmem:[#allocation10] sm:$0xff]  }
 0x590   :  { %2011 = vmatpush3.bf16.msra.mxu0 %v2096_v55  ;;  %v2118_v55 = vld [vmem:[#allocation11 + $0x44] ss:$16 sps:$4 sm:$0xff]  }
 0x591   :  { %831 = vmax.xlane.f32.xlu1 %v830_v56  ;;  %v2097_v56 = vld [vmem:[#allocation10 + $0x8] sm:$0xff]   ;;  %2012 = vmatprep.subr.bf16.mxu0 %v2423_v5 }
 0x593   :  { %710 = vmax.xlane.f32.xlu0 %v709_v57  ;;  %v2098_v57 = vld [vmem:[#allocation10 + $0x10] sm:$0xff]  }
 0x594   :  { %2013 = vmatpush3.bf16.msra.mxu0 %v2097_v56  ;;  %v2121_v56 = vld [vmem:[#allocation11 + $0x4c] ss:$16 sps:$4 sm:$0xff]  }
 0x595   :  { %2014 = vmatprep.subr.bf16.mxu0 %v2423_v5 }
 0x597   :  { %828 = vmax.xlane.f32.xlu0 %v827_v58  ;;  %v2099_v58 = vld [vmem:[#allocation10 + $0x18] sm:$0xff]  }
 0x598   :  { %2015 = vmatpush3.bf16.msra.mxu0 %v2098_v57  ;;  %v2116_v57 = vld [vmem:[#allocation11 + $0x40] ss:$16 sps:$4 sm:$0xff]  }
 0x599   :  { %2016 = vmatprep.subr.bf16.mxu0 %v2423_v5 }
 0x59c   :  { %2017 = vmatpush3.bf16.msra.mxu0 %v2099_v58  ;;  %v2119_v58 = vld [vmem:[#allocation11 + $0x48] ss:$16 sps:$4 sm:$0xff]  }
 0x59d   :  { %2018 = vmatprep.subr.bf16.mxu0 %v2423_v5 }
 0x618   :  { %v586_v59 = vpop.xlane.xlu0 %585 }
 0x619   :  { %v590_v8 = vsub.f32 %v577_v45, %v586_v59  ;;  %v2100_v59 = vld [vmem:[#allocation10 + $0x20] sm:$0xff]  }
 0x61a   :  { %v589_v60 = vpop.xlane.xlu1 %588  ;;  %2019 = vmatpush3.bf16.msra.mxu0 %v2100_v59  ;;  %v2124_v59 = vld [vmem:[#allocation11 + $0x64] ss:$16 sps:$4 sm:$0xff]  }
 0x61b   :  { %v591_v9 = vsub.f32 %v580_v50, %v589_v60  ;;  %v592_v14 = vmul.f32 1.442695, %v590_v8  ;;  %2020 = vmatprep.subr.bf16.mxu0 %v2423_v5 }
 0x61c   :  { %v708_v61 = vpop.xlane.xlu0 %707 }
 0x61d   :  { %v712_v62 = vsub.f32 %v699_v39, %v708_v61  ;;  %v594_v15 = vmul.f32 1.442695, %v591_v9  ;;  %v2103_v9 = vld [vmem:[#allocation10 + $0x38] sm:$0xff]  }
 0x61e   :  { %v832_v2 = vpop.xlane.xlu1 %831 }
 0x61f   :  { %v714_v3 = vmul.f32 1.442695, %v712_v62  ;;  %v834_v4 = vsub.f32 %v823_v52, %v832_v2  ;;  %v2101_v62 = vld [vmem:[#allocation10 + $0x28] sm:$0xff]  }
 0x620   :  { %v711_v6 = vpop.xlane.xlu0 %710  ;;  %2021 = vmatpush3.bf16.msra.mxu0 %v2101_v62  ;;  %v2125_v62 = vld [vmem:[#allocation11 + $0x68] ss:$16 sps:$4 sm:$0xff]  }
 0x621   :  { %2196 = vpow2.f32 %v714_v3  ;;  %v713_v7 = vsub.f32 %v702_v43, %v711_v6  ;;  %v837_v10 = vmul.f32 1.442695, %v834_v4  ;;  %v2102_v6 = vld [vmem:[#allocation10 + $0x30] sm:$0xff]   ;;  %2022 = vmatprep.subr.bf16.mxu0 %v2423_v5 }
 0x623   :  { %v716_v11 = vmul.f32 1.442695, %v713_v7 }
 0x624   :  { %v829_v12 = vpop.xlane.xlu0 %828  ;;  %2023 = vmatpush3.bf16.msra.mxu0 %v2102_v6  ;;  %v2131_v6 = vld [vmem:[#allocation11 + $0x88] ss:$16 sps:$4 sm:$0xff]  }
 0x625   :  { %2198 = vpow2.f32 %v716_v11  ;;  %v833_v13 = vsub.f32 %v820_v47, %v829_v12  ;;  %2024 = vmatprep.subr.bf16.mxu0 %v2423_v5 }
 0x626   :  { %2200 = vpow2.f32 %v837_v10 }
 0x627   :  { %v835_v16 = vmul.f32 1.442695, %v833_v13 }
 0x628   :  { %2025 = vmatpush3.bf16.msra.mxu0 %v2103_v9  ;;  %v2134_v9 = vld [vmem:[#allocation11 + $0xa0] ss:$16 sps:$4 sm:$0xff]  }
 0x629   :  { %2202 = vpow2.f32 %v835_v16 }
 0x62a   :  { %2204 = vpow2.f32 %v592_v14 }
 0x62b   :  { %v2197_v17 = vpop.eup %2196  ;;  %2206 = vpow2.f32 %v594_v15 }
 0x62c   :  { %v718_v18 = vsel %vm463_vm2, %v2197_v17, 0.0 }
 0x62d   :  { %719 = vadd.xlane.f32.xlu0 %v718_v18 }
 0x62f   :  { %v2199_v19 = vpop.eup %2198 }
 0x630   :  { %v721_v20 = vsel %vm463_vm2, %v2199_v19, 0.0  ;;  %v2201_v21 = vpop.eup %2200 }
 0x631   :  { %722 = vadd.xlane.f32.xlu1 %v721_v20  ;;  %v842_v25 = vsel %vm463_vm2, %v2201_v21, 0.0 }
 0x633   :  { %v2203_v22 = vpop.eup %2202 }
 0x634   :  { %v2205_v23 = vpop.eup %2204  ;;  %v839_v24 = vsel %vm463_vm2, %v2203_v22, 0.0 }
 0x635   :  { %v2207_v26 = vpop.eup %2206  ;;  %840 = vadd.xlane.f32.xlu0 %v839_v24  ;;  %843 = vadd.xlane.f32.xlu1 %v842_v25  ;;  %v596_v28 = vsel %vm463_vm2, %v2205_v23, 0.0 }
 0x636   :  { %v599_v29 = vsel %vm463_vm2, %v2207_v26, 0.0 }
 0x639   :  { %597 = vadd.xlane.f32.xlu0 %v596_v28  ;;  %600 = vadd.xlane.f32.xlu1 %v599_v29 }
 0x64a   :  { %729 = vrot.lane.b32.xlu1 %v2608_v63, %s2419_s0 }
 0x64e   :  { %850 = vrot.lane.b32.xlu1 %v2608_v63, %s2427_s21 }
 0x64f   :  { %608 = vrot.lane.b32.xlu0 %v2608_v63, %s2426_s7 }
 0x6ba   :  { %v720_v30 = vpop.xlane.xlu0 %719 }
 0x6be   :  { %v723_v31 = vpop.xlane.xlu1 %722 }
 0x6c2   :  { %v841_v32 = vpop.xlane.xlu0 %840  ;;  %v844_v33 = vpop.xlane.xlu1 %843 }
 0x6c6   :  { %v598_v34 = vpop.xlane.xlu0 %597  ;;  %v601_v35 = vpop.xlane.xlu1 %600 }
 0x6c7   :  { %2208 = vrcp.f32 %v598_v34  ;;  %v1788_v34 = vld [vmem:[#allocation5 + $0x4] ss:$0 sm:$0xff] }
 0x6c8   :  { %2210 = vrcp.f32 %v601_v35 }
 0x6c9   :  { %2212 = vrcp.f32 %v723_v31 }
 0x6ca   :  { %v609_v36 = vpop.permute.xlu0 %608  ;;  %2214 = vrcp.f32 %v720_v30  ;;  %v730_v44 = vpop.permute.xlu1 %729 }
 0x6cb   :  { %1981 = vmatpush3.bf16.msra.mxu1 %v609_v36  ;;  %2216 = vrcp.f32 %v841_v32 }
 0x6cc   :  { %1992 = vmatprep.subr.bf16.mxu1 %v2423_v5  ;;  %2218 = vrcp.f32 %v844_v33 }
 0x6ce   :  { %v851_v51 = vpop.permute.xlu1 %850 }
 0x6d1   :  { %v2209_v38 = vpop.eup %2208 }
 0x6d2   :  { %v2211_v39 = vpop.eup %2210  ;;  %v604_v41 = vmul.f32 %v2209_v38, %v2205_v23 }
 0x6d3   :  { %v605_v42 = vmul.f32 %v2211_v39, %v2207_v26  ;;  %v2213_v43 = vpop.eup %2212 }
 0x6d4   :  { %v2215_v45 = vpop.eup %2214  ;;  %v727_v46 = vmul.f32 %v2213_v43, %v2199_v19  ;;  %v2106_v43 = vld [vmem:[#allocation11 + $0x4] ss:$16 sps:$4 sm:$0xff]  }
 0x6d5   :  { %v606_v63 = vpack.c.bf16 %v605_v42, %v604_v41  ;;  %v726_v47 = vmul.f32 %v2215_v45, %v2197_v17  ;;  %v2217_v48 = vpop.eup %2216  ;;  %v2112_v45 = vld [vmem:[#allocation11 + $0x24] ss:$16 sps:$4 sm:$0xff]  }
 0x6d6   :  { %v2219_v50 = vpop.eup %2218  ;;  %v847_v52 = vmul.f32 %v2217_v48, %v2203_v22 }
 0x6d7   :  { %1983 = vmatmul.mubr.msk.bf16.vlgmr.msra.gmra.mrb[16].mxu1 %vm463_vm2, %v606_v63  ;;  %v728_v49 = vpack.c.bf16 %v727_v46, %v726_v47  ;;  %v848_v53 = vmul.f32 %v2219_v50, %v2201_v21  ;;  %v2104_v63 = vld [vmem:[#allocation11] ss:$16 sps:$4 sm:$0xff]   ;;  %v2115_v46 = vld [vmem:[#allocation11 + $0x2c] ss:$16 sps:$4 sm:$0xff]   ;;  %v2113_v47 = vld [vmem:[#allocation11 + $0x28] ss:$16 sps:$4 sm:$0xff]  }
 0x6d8   :  { %1993 = vmatpush3.bf16.msra.mxu1 %v730_v44  ;;  %1994 = vmatprep.mubr.msk.bf16.mxu1 %vm2425_vm0, %v2423_v5  ;;  %v2109_v44 = vld [vmem:[#allocation11 + $0xc] ss:$16 sps:$4 sm:$0xff]  }
 0x6d9   :  { %2004 = vmatprep.subr.bf16.mxu1 %v2423_v5  ;;  %v849_v54 = vpack.c.bf16 %v848_v53, %v847_v52  ;;  %1333 = vmatprep.subr.bf16.mxu0 %v2109_v44  ;;  %v2160_v44 = vld [vmem:[#allocation13 + $0x50] sm:$0xff]  }
 0x6df   :  { %1995 = vmatmul.mubr.msk.bf16.vlgmr.msra.gmra.mrb[20].mxu1 %vm463_vm2, %v728_v49 }
 0x6e0   :  { %2005 = vmatpush3.bf16.msra.mxu1 %v851_v51  ;;  %2006 = vmatprep.mubr.msk.bf16.mxu1 %vm2425_vm0, %v2423_v5 }
 0x6e1   :  { %1290 = vmatprep.subr.bf16.mxu1 %v2106_v43  ;;  %v2158_v43 = vld [vmem:[#allocation13 + $0x8] sm:$0xff]  }
 0x6e7   :  { %2007 = vmatmul.mubr.msk.bf16.vlgmr.msra.gmra.mrb[24].mxu1 %vm463_vm2, %v849_v54 }
 0x6e8   :  { %1322 = vmatprep.mubr.bf16.mxu1 %v2424_v27  ;;  %1291 = vmatpush1.bf16.msra.mxu1 %v2104_v63  ;;  %v2157_v63 = vld [vmem:[#allocation13 + $0xc8] sm:$0xff]  }
 0x6e9   :  { %1292 = vmatprep.subr.bf16.mxu1 %v2112_v45  ;;  %v2161_v45 = vld [vmem:[#allocation13 + $0xd0] sm:$0xff]  }
 0x7aa   :  { %v648_v60 = vpop.f32.mrb[16].mxu1 }
 0x7ab   :  { %v1984_v61 = vpop.f32.mrb[17].mxu1 }
 0x7ac   :  { %v651_v2 = vpop.f32.mrb[18].mxu1  ;;  %v2122_v61 = vld [vmem:[#allocation11 + $0x60] ss:$16 sps:$4 sm:$0xff]  }
 0x7ad   :  { %v2049_v3 = vpack.i.bf16 %v651_v2, %v648_v60  ;;  %v1985_v4 = vpop.f32.mrb[19].mxu1  ;;  %v2127_v60 = vld [vmem:[#allocation11 + $0x6c] ss:$16 sps:$4 sm:$0xff]   ;;  %v2130_v2 = vld [vmem:[#allocation11 + $0x84] ss:$16 sps:$4 sm:$0xff]  }
 0x7ae   :  { %v2128_v4 = vld [vmem:[#allocation11 + $0x80] ss:$16 sps:$4 sm:$0xff]  }
 0x7af   :  { %2050 = vrot.lane.b32.xlu1 %v2049_v3, %s2427_s21  ;;  %v2133_v3 = vld [vmem:[#allocation11 + $0x8c] ss:$16 sps:$4 sm:$0xff]  }
 0x7b2   :  { %v769_v7 = vpop.f32.mrb[20].mxu1 }
 0x7b3   :  { %v1996_v8 = vpop.f32.mrb[21].mxu1 }
 0x7b4   :  { %v772_v10 = vpop.f32.mrb[22].mxu1  ;;  %v2139_v8 = vld [vmem:[#allocation11 + $0xac] ss:$16 sps:$4 sm:$0xff]  }
 0x7b5   :  { %v2054_v11 = vpack.i.bf16 %v772_v10, %v769_v7  ;;  %v1997_v12 = vpop.f32.mrb[23].mxu1  ;;  %v2136_v7 = vld [vmem:[#allocation11 + $0xa4] ss:$16 sps:$4 sm:$0xff]   ;;  %v2137_v10 = vld [vmem:[#allocation11 + $0xa8] ss:$16 sps:$4 sm:$0xff]  }
 0x7b6   :  { %v2145_v12 = vld [vmem:[#allocation11 + $0xcc] ss:$16 sps:$4 sm:$0xff]  }
 0x7b7   :  { %2055 = vrot.lane.b32.xlu0 %v2054_v11, %s2419_s0  ;;  %v2142_v11 = vld [vmem:[#allocation11 + $0xc4] ss:$16 sps:$4 sm:$0xff]  }
 0x7ba   :  { %v890_v13 = vpop.f32.mrb[24].mxu1 }
 0x7bb   :  { %v2008_v14 = vpop.f32.mrb[25].mxu1 }
 0x7bc   :  { %v893_v15 = vpop.f32.mrb[26].mxu1  ;;  %v2143_v14 = vld [vmem:[#allocation11 + $0xc8] ss:$16 sps:$4 sm:$0xff]  }
 0x7bd   :  { %v2059_v16 = vpack.i.bf16 %v893_v15, %v890_v13  ;;  %v2009_v17 = vpop.f32.mrb[27].mxu1  ;;  %v2140_v13 = vld [vmem:[#allocation11 + $0xc0] ss:$16 sps:$4 sm:$0xff]   ;;  %v2148_v15 = vld [vmem:[#allocation11 + $0xe4] ss:$16 sps:$4 sm:$0xff]  }
 0x7be   :  { %v2146_v17 = vld [vmem:[#allocation11 + $0xe0] ss:$16 sps:$4 sm:$0xff]  }
 0x7bf   :  { %2060 = vrot.lane.b32.xlu1 %v2059_v16, %s2426_s7  ;;  %v2151_v16 = vld [vmem:[#allocation11 + $0xec] ss:$16 sps:$4 sm:$0xff]  }
 0x821   :  { %v2051_v18 = vpop.permute.xlu1 %2050 }
 0x822   :  { %v2053_v20 = vunpack.i.h.bf16 %v2051_v18  ;;  %v2052_v21 = vunpack.i.l.bf16 %v2051_v18  ;;  %v2149_v18 = vld [vmem:[#allocation11 + $0xe8] ss:$16 sps:$4 sm:$0xff]  }
 0x824   :  { %v922_v24 = vsel %vm415_vm1, %v2647_v40, %v2053_v20  ;;  %v921_v25 = vsel %vm415_vm1, %v2645_v37, %v2052_v21  ;;  %v2153_v20 = vld [vmem:[#allocation13 + $0xc0] sm:$0xff]  }
 0x829   :  { %v2056_v19 = vpop.permute.xlu0 %2055 }
 0x82a   :  { %v2058_v5 = vunpack.i.h.bf16 %v2056_v19  ;;  %v2057_v22 = vunpack.i.l.bf16 %v2056_v19  ;;  %v2152_v19 = vld [vmem:[#allocation13 + $0x40] sm:$0xff]  }
 0x82c   :  { %v925_v29 = vsel %vm923_vm3, %v922_v24, %v2058_v5  ;;  %v924_v30 = vsel %vm923_vm3, %v921_v25, %v2057_v22 }
 0x831   :  { %v2061_v23 = vpop.permute.xlu1 %2060 }
 0x832   :  { %v2063_v26 = vunpack.i.h.bf16 %v2061_v23  ;;  %v2062_v28 = vunpack.i.l.bf16 %v2061_v23 }
 0x834   :  { %v928_v31 = vsel %vm926_vm4, %v925_v29, %v2063_v26  ;;  %v927_v32 = vsel %vm926_vm4, %v924_v30, %v2062_v28  ;;  %v1797_v29 = vld [vmem:[#allocation5 + $0x2] ss:$0 sm:$0xff] }
 0x835   :  { %v929_v33 = vpack.c.bf16 %v928_v31, %v927_v32 }
 0x837   :  { %2027 = vmatmul.mubr.bf16.vlgmr.msra.gmra.mrb[12].mxu0 %v929_v33  ;;  %v1798_v33 = vld [vmem:[#allocation5 + $0x3] ss:$0 sm:$0xff] }
 0x838   :  { %1365 = vmatprep.mubr.bf16.mxu0 %v2424_v27  ;;  %v2107_v27 = vld [vmem:[#allocation11 + $0x8] ss:$16 sps:$4 sm:$0xff]  }
 0x839   :  { %1334 = vmatpush1.bf16.msra.mxu0 %v2107_v27  ;;  %v2159_v27 = vld [vmem:[#allocation13 + $0x88] sm:$0xff]  }
 0x83a   :  { %1335 = vmatprep.subr.bf16.mxu0 %v2115_v46  ;;  %v2162_v46 = vld [vmem:[#allocation13 + $0x10] sm:$0xff]  }
 0x83d   :  { %1336 = vmatpush1.bf16.msra.mxu0 %v2113_v47  ;;  %v2164_v47 = vld [vmem:[#allocation13 + $0x58] sm:$0xff]  }
 0x83e   :  { %1337 = vmatprep.subr.bf16.mxu0 %v2121_v56  ;;  %v2174_v56 = vld [vmem:[#allocation13 + $0x28] sm:$0xff]  }
 0x841   :  { %1338 = vmatpush1.bf16.msra.mxu0 %v2119_v58  ;;  %v2176_v58 = vld [vmem:[#allocation13 + $0x70] sm:$0xff]  }
 0x842   :  { %1339 = vmatprep.subr.bf16.mxu0 %v2127_v60  ;;  %v2178_v60 = vld [vmem:[#allocation13 + $0x30] sm:$0xff]  }
 0x845   :  { %1340 = vmatpush1.bf16.msra.mxu0 %v2125_v62  ;;  %v2180_v62 = vld [vmem:[#allocation13 + $0x78] sm:$0xff]  }
 0x846   :  { %1341 = vmatprep.subr.bf16.mxu0 %v2133_v3  ;;  %v2182_v3 = vld [vmem:[#allocation13 + $0x38] sm:$0xff]  }
 0x849   :  { %1342 = vmatpush1.bf16.msra.mxu0 %v2131_v6  ;;  %v1110_v6 = vlaneseq }
 0x84a   :  { %1343 = vmatprep.subr.bf16.mxu0 %v2139_v8 }
 0x84d   :  { %1344 = vmatpush1.bf16.msra.mxu0 %v2137_v10  ;;  %v1108_v10 = vld [vmem:[%s2734_s2] sm:$0xf]  ;;  %s2428_s2 = smov [#allocation14]  }
 0x84e   :  { %1345 = vmatprep.subr.bf16.mxu0 %v2145_v12  ;;  %s1739_s26 = sshll.u32 %s2428_s2, 4  ;;  %s1740_s26 = int_to_ptr.vmem [resolvable:$true] %s1739_s26 }
 0x84f   :  { %s2378_s27 = scalar_lea.vmem %s1740_s26, 256  ;;  %p2383_p1 = scmp.lt.s32.totalorder %s1740_s26, %s1740_s26 }
 0x850   :  { %p2379_p0 = scmp.ne.s32.totalorder %s1740_s26, %s2378_s27  ;;  %p2384_p2 = scmp.lt.s32.totalorder %s2378_s27, %s2378_s27 }
 0x851   :  { %1346 = vmatpush1.bf16.msra.mxu0 %v2143_v14 }
 0x852   :  { %1347 = vmatprep.subr.bf16.mxu0 %v2151_v16  ;;  %p2385_p3 = por %p2384_p2, %p2383_p1 }
 0x854   :  { %p2386_p4 = pnand %p2385_p3, %p2379_p0 }
 0x855   :  { %1348 = vmatpush1.bf16.msra.mxu0 %v2149_v18 }
 0x856   :  { %1920 = vmatprep.subr.bf16.mxu0 %v2153_v20 }
 0x90a   :  { %v1032_v35 = vpop.f32.mrb[12].mxu0 }
 0x90b   :  { %v1033_v36 = vadd.f32 %v1788_v34, %v1032_v35  ;;  %v2028_v38 = vpop.f32.mrb[13].mxu0 }
 0x90c   :  { %v1035_v39 = vpop.f32.mrb[14].mxu0  ;;  %v2154_v38 = vld [vmem:[#allocation13] sm:$0xff]  }
 0x90d   :  { %v2693_v40 = vadd.f32 %v1033_v36, %v2573_v0  ;;  %v1036_v41 = vadd.f32 %v1788_v34, %v1035_v39  ;;  %v2029_v37 = vpop.f32.mrb[15].mxu0  ;;  %v2110_v0 = vld [vmem:[#allocation11 + $0x20] ss:$16 sps:$4 sm:$0xff]  }
 0x90e   :  { %1293 = vmatpush1.bf16.msra.mxu1 %v2110_v0  ;;  %v2155_v39 = vld [vmem:[#allocation13 + $0x80] sm:$0xff]   ;;  %v2156_v37 = vld [vmem:[#allocation13 + $0x48] sm:$0xff]   ;;  %v2163_v0 = vld [vmem:[#allocation13 + $0x90] sm:$0xff]  }
 0x90f   :  { %v2696_v42 = vadd.f32 %v1036_v41, %v2575_v1  ;;  %1041 = vadd.xlane.f32.xlu0 %v2693_v40  ;;  %1294 = vmatprep.subr.bf16.mxu1 %v2118_v55  ;;  %v2173_v55 = vld [vmem:[#allocation13 + $0xe8] sm:$0xff]  }
 0x911   :  { %1043 = vadd.xlane.f32.xlu1 %v2696_v42 }
 0x912   :  { %1295 = vmatpush1.bf16.msra.mxu1 %v2116_v57  ;;  %v2175_v57 = vld [vmem:[#allocation13 + $0xa8] sm:$0xff]  }
 0x913   :  { %1296 = vmatprep.subr.bf16.mxu1 %v2124_v59  ;;  %v2177_v59 = vld [vmem:[#allocation13 + $0xf0] sm:$0xff]  }
 0x916   :  { %1297 = vmatpush1.bf16.msra.mxu1 %v2122_v61  ;;  %v2179_v61 = vld [vmem:[#allocation13 + $0xb0] sm:$0xff]  }
 0x917   :  { %1298 = vmatprep.subr.bf16.mxu1 %v2130_v2  ;;  %v2181_v2 = vld [vmem:[#allocation13 + $0xf8] sm:$0xff]  }
 0x91a   :  { %1299 = vmatpush1.bf16.msra.mxu1 %v2128_v4  ;;  %v2183_v4 = vld [vmem:[#allocation13 + $0xb8] sm:$0xff]  }
 0x91b   :  { %1300 = vmatprep.subr.bf16.mxu1 %v2136_v7  ;;  %v1111_v7 = vshrl.u32 %v1110_v6, 7 }
 0x91d   :  { %v1112_v8 = vsub.s32 0, %v1111_v7  ;;  %v1124_v12 = vsub.s32 3, %v1111_v7 }
 0x91e   :  { %1301 = vmatpush1.bf16.msra.mxu1 %v2134_v9  ;;  %v1120_v9 = vsub.s32 2, %v1111_v7 }
 0x91f   :  { %1302 = vmatprep.subr.bf16.mxu1 %v2142_v11  ;;  %v1116_v11 = vsub.s32 1, %v1111_v7  ;;  %v1125_v16 = vrot.slane %v1108_v10, %v1124_v12 }
 0x920   :  { %v1121_v14 = vrot.slane %v1108_v10, %v1120_v9 }
 0x922   :  { %1303 = vmatpush1.bf16.msra.mxu1 %v2140_v13  ;;  %v1113_v13 = vrot.slane %v1108_v10, %v1112_v8 }
 0x923   :  { %1304 = vmatprep.subr.bf16.mxu1 %v2148_v15  ;;  %v1117_v15 = vrot.slane %v1108_v10, %v1116_v11 }
 0x926   :  { %1305 = vmatpush1.bf16.msra.mxu1 %v2146_v17 }
 0x927   :  { %1898 = vmatprep.subr.bf16.mxu1 %v2152_v19 }
 0x99c   :  { %v1042_v1 = vpop.xlane.xlu0 %1041 }
 0x99d   :  { %v1045_v48 = vmul.f32 0.0078125, %v1042_v1  ;;  %v2165_v1 = vld [vmem:[#allocation13 + $0xd8] sm:$0xff]  }
 0x99e   :  { %v1044_v49 = vpop.xlane.xlu1 %1043 }
 0x99f   :  { %v2701_v50 = vsub.f32 %v2693_v40, %v1045_v48  ;;  %v1046_v51 = vmul.f32 0.0078125, %v1044_v49  ;;  %v2166_v48 = vld [vmem:[#allocation13 + $0x18] sm:$0xff]  }
 0x9a0   :  { %v2167_v49 = vld [vmem:[#allocation13 + $0x98] sm:$0xff]  }
 0x9a1   :  { %v2704_v52 = vsub.f32 %v2696_v42, %v1046_v51  ;;  %v1049_v53 = vmul.f32 %v2701_v50, %v2701_v50  ;;  %v2169_v51 = vld [vmem:[#allocation13 + $0xe0] sm:$0xff]  }
 0x9a3   :  { %1051 = vadd.xlane.f32.xlu0 %v1049_v53  ;;  %v1050_v54 = vmul.f32 %v2704_v52, %v2704_v52  ;;  %v2171_v53 = vld [vmem:[#allocation13 + $0xa0] sm:$0xff]  }
 0x9a7   :  { %1053 = vadd.xlane.f32.xlu0 %v1050_v54  ;;  %v2172_v54 = vld [vmem:[#allocation13 + $0x68] sm:$0xff]  }
 0xa30   :  { %v1052_v21 = vpop.xlane.xlu0 %1051 }
 0xa31   :  { %v1055_v5 = vmul.f32 0.0078125, %v1052_v21 }
 0xa33   :  { %v1057_v22 = vadd.f32 1e-05, %v1055_v5 }
 0xa34   :  { %v1054_v23 = vpop.xlane.xlu0 %1053 }
 0xa35   :  { %2220 = vrsqrt.f32 %v1057_v22  ;;  %v1056_v24 = vmul.f32 0.0078125, %v1054_v23 }
 0xa37   :  { %v1058_v25 = vadd.f32 1e-05, %v1056_v24 }
 0xa39   :  { %2222 = vrsqrt.f32 %v1058_v25 }
 0xa3f   :  { %v2221_v26 = vpop.eup %2220 }
 0xa40   :  { %v1061_v28 = vmul.f32 %v2221_v26, %v2701_v50  ;;  %v2168_v50 = vld [vmem:[#allocation13 + $0x60] sm:$0xff]  }
 0xa42   :  { %v1067_v32 = vmul.f32 %v1797_v29, %v1061_v28 }
 0xa43   :  { %v2223_v30 = vpop.eup %2222 }
 0xa44   :  { %v1062_v31 = vmul.f32 %v2223_v30, %v2704_v52  ;;  %v1073_v35 = vadd.f32 %v1798_v33, %v1067_v32  ;;  %v2170_v52 = vld [vmem:[#allocation13 + $0x20] sm:$0xff]  }
 0xa46   :  { %v1068_v34 = vmul.f32 %v1797_v29, %v1062_v31 }
 0xa48   :  { %v1074_v36 = vadd.f32 %v1798_v33, %v1068_v34 }
 0xa4a   :  { %v1075_v41 = vpack.c.bf16 %v1074_v36, %v1073_v35 }
 0xa4c   :  { %1323 = vmatmul.mubr.bf16.vlgmr.msra.gmra.mrb[28].mxu1 %v1075_v41  ;;  %1366 = vmatmul.mubr.bf16.vlgmr.msra.gmra.mrb[16].mxu0 %v1075_v41 }
 0xa4d   :  { %1899 = vmatpush3.bf16.msra.mxu1 %v2154_v38  ;;  %1921 = vmatpush3.bf16.msra.mxu0 %v2155_v39 }
 0xa4e   :  { %1900 = vmatprep.subr.bf16.mxu1 %v2156_v37  ;;  %1922 = vmatprep.subr.bf16.mxu0 %v2157_v63 }
 0xa51   :  { %1901 = vmatpush3.bf16.msra.mxu1 %v2158_v43  ;;  %1923 = vmatpush3.bf16.msra.mxu0 %v2159_v27 }
 0xa52   :  { %1902 = vmatprep.subr.bf16.mxu1 %v2160_v44  ;;  %1924 = vmatprep.subr.bf16.mxu0 %v2161_v45 }
 0xa55   :  { %1903 = vmatpush3.bf16.msra.mxu1 %v2162_v46  ;;  %1925 = vmatpush3.bf16.msra.mxu0 %v2163_v0  ;;  %v1831_v0 = vld [vmem:[#allocation5 + $0x5] ss:$0 sm:$0xff] }
 0xa56   :  { %1904 = vmatprep.subr.bf16.mxu1 %v2164_v47  ;;  %1926 = vmatprep.subr.bf16.mxu0 %v2165_v1 }
 0xa59   :  { %1905 = vmatpush3.bf16.msra.mxu1 %v2166_v48  ;;  %1927 = vmatpush3.bf16.msra.mxu0 %v2167_v49 }
 0xa5a   :  { %1906 = vmatprep.subr.bf16.mxu1 %v2168_v50  ;;  %1928 = vmatprep.subr.bf16.mxu0 %v2169_v51 }
 0xa5d   :  { %1907 = vmatpush3.bf16.msra.mxu1 %v2170_v52  ;;  %1929 = vmatpush3.bf16.msra.mxu0 %v2171_v53 }
 0xa5e   :  { %1908 = vmatprep.subr.bf16.mxu1 %v2172_v54  ;;  %1930 = vmatprep.subr.bf16.mxu0 %v2173_v55 }
 0xa61   :  { %1909 = vmatpush3.bf16.msra.mxu1 %v2174_v56  ;;  %1931 = vmatpush3.bf16.msra.mxu0 %v2175_v57 }
 0xa62   :  { %1910 = vmatprep.subr.bf16.mxu1 %v2176_v58  ;;  %1932 = vmatprep.subr.bf16.mxu0 %v2177_v59 }
 0xa65   :  { %1911 = vmatpush3.bf16.msra.mxu1 %v2178_v60  ;;  %1933 = vmatpush3.bf16.msra.mxu0 %v2179_v61 }
 0xa66   :  { %1912 = vmatprep.subr.bf16.mxu1 %v2180_v62  ;;  %1934 = vmatprep.subr.bf16.mxu0 %v2181_v2 }
 0xa69   :  { %1913 = vmatpush3.bf16.msra.mxu1 %v2182_v3  ;;  %1935 = vmatpush3.bf16.msra.mxu0 %v2183_v4 }
 0xb1f   :  { %v1324_v17 = vpop.f32.mrb[28].mxu1  ;;  %v1367_v18 = vpop.f32.mrb[16].mxu0 }
 0xb20   :  { %v1325_v19 = vadd.f32 %v1324_v17, %v1113_v13  ;;  %v1368_v20 = vadd.f32 %v1367_v18, %v1121_v14  ;;  %v1326_v21 = vpop.f32.mrb[29].mxu1  ;;  %v1369_v5 = vpop.f32.mrb[17].mxu0 }
 0xb21   :  { %v1327_v22 = vadd.f32 %v1326_v21, %v1117_v15  ;;  %v1370_v23 = vadd.f32 %v1369_v5, %v1125_v16  ;;  %v1328_v24 = vpop.f32.mrb[30].mxu1  ;;  %v1371_v25 = vpop.f32.mrb[18].mxu0 }
 0xb22   :  { %v1329_v26 = vadd.f32 %v1328_v24, %v1113_v13  ;;  %v1372_v28 = vadd.f32 %v1371_v25, %v1121_v14  ;;  %v1330_v29 = vpop.f32.mrb[31].mxu1  ;;  %v1373_v30 = vpop.f32.mrb[19].mxu0  ;;  %v1376_v33 = vmax.f32 %v1325_v19, 0.0  ;;  %v1378_v34 = vmax.f32 %v1368_v20, 0.0 }
 0xb23   :  { %v1331_v31 = vadd.f32 %v1330_v29, %v1117_v15  ;;  %v1374_v32 = vadd.f32 %v1373_v30, %v1125_v16  ;;  %v1377_v38 = vmax.f32 %v1327_v22, 0.0  ;;  %v1379_v39 = vmax.f32 %v1370_v23, 0.0 }
 0xb24   :  { %v1380_v35 = vmax.f32 %v1329_v26, 0.0  ;;  %v1382_v36 = vmax.f32 %v1372_v28, 0.0 }
 0xb25   :  { %v1381_v41 = vmax.f32 %v1331_v31, 0.0  ;;  %v1383_v37 = vmax.f32 %v1374_v32, 0.0 }
 0xb26   :  { %v1384_v63 = vpack.c.bf16 %v1380_v35, %v1376_v33  ;;  %v1386_v43 = vpack.c.bf16 %v1382_v36, %v1378_v34 }
 0xb27   :  { %v1385_v27 = vpack.c.bf16 %v1381_v41, %v1377_v38  ;;  %v1387_v44 = vpack.c.bf16 %v1383_v37, %v1379_v39 }
 0xb29   :  { %1680 = vmatprep.mubr.bf16.mxu1 %v1385_v27  ;;  %1721 = vmatprep.mubr.bf16.mxu0 %v1387_v44 }
 0xb2a   :  { %1681 = vmatmul.mubr.bf16.vlgmr.msra.gmra.mrb[32].mxu1 %v1384_v63  ;;  %1722 = vmatmul.mubr.bf16.vlgmr.msra.gmra.mrb[20].mxu0 %v1386_v43 }
 0xbfd   :  { %v1914_v45 = vpop.f32.mrb[32].mxu1  ;;  %v1936_v46 = vpop.f32.mrb[20].mxu0 }
 0xbfe   :  { %v1915_v47 = vpop.f32.mrb[33].mxu1  ;;  %v1937_v1 = vpop.f32.mrb[21].mxu0 }
 0xbff   :  { %v1916_v48 = vadd.f32 %v1915_v47, %v1914_v45  ;;  %v1938_v49 = vadd.f32 %v1937_v1, %v1936_v46  ;;  %v1917_v50 = vpop.f32.mrb[34].mxu1  ;;  %v1939_v51 = vpop.f32.mrb[22].mxu0 }
 0xc00   :  { %v1918_v52 = vpop.f32.mrb[35].mxu1  ;;  %v1940_v53 = vpop.f32.mrb[23].mxu0 }
 0xc01   :  { %v1683_v54 = vadd.f32 %v1916_v48, %v1831_v0  ;;  %v1919_v55 = vadd.f32 %v1918_v52, %v1917_v50  ;;  %v1941_v56 = vadd.f32 %v1940_v53, %v1939_v51 }
 0xc03   :  { %v1724_v57 = vadd.f32 %v1938_v49, %v1683_v54  ;;  %v1686_v58 = vadd.f32 %v1919_v55, %v1831_v0 }
 0xc05   :  { %v1730_v59 = vadd.f32 %v1724_v57, %v2693_v40  ;;  %v1727_v60 = vadd.f32 %v1941_v56, %v1686_v58 }
 0xc07   :  { %1732 = vst [vmem:[#allocation14] sm:$0xff] %v1730_v59  ;;  %v1731_v61 = vadd.f32 %v1727_v60, %v2696_v42 }
 0xc09   :  { %1733 = vst [vmem:[#allocation14 + $0x8] sm:$0xff] %v1731_v61 }
 0xc0a   :  { %2389 = shalt.err (!%p2386_p4)
}
 0xc0b   :  { %s2390_s9 = scalar_lea.hbm %s2740_s8, 256 }
 0xc0c   :  { %p2391_p5 = scmp.ne.s32.totalorder %s2740_s8, %s2390_s9  ;;  %p2394_p6 = scmp.lt.u32.totalorder %s2390_s9, %s2740_s8 }
 0xc0e   :  { %p2396_p7 = pnand %p2394_p6, %p2391_p5 }
 0xc10   :  { %2399 = shalt.err (!%p2396_p7)
}
 0xc11   :  { %1745 = dma.vmem_to_hbm [thread:$0]  %s1740_s26, 256, %s2740_s8, [#allocation4], %s2413_s28, %s2413_s28, %s2414_s29  }
 0xc12   :  { %2408 = dma.done.wait [#allocation4], 256  }
 0xc13   :  { %2409 = vsyncadd [#allocation4], 4294967040 }
 0xc14   :  { %1749 = vsyncpa [#allocation3], 1 }
 0xc15   :  { %1750 = vsyncpa [#allocation6], 1 }
 0xc16   :  { %1751 = vsyncpa [#allocation9], 1 }
 0xc17   :  { %1752 = vsyncpa [#allocation12], 1 }
 0xc18   :  { %1753 = vsyncpa [#allocation4], 1 }

</bundles_post_ra>
